<compile_context>
chip_gen: v5e
topology: v5e:2x2
jax: 0.10.0
libtpu: 0.0.40
codegen_flags: <defaults>
</compile_context>

<pallas_src>
import functools

import jax
import jax.numpy as jnp
from jax.experimental import pallas as pl
from jax.experimental.pallas import tpu as pltpu


def _round_up(n: int, m: int) -> int:
    return pl.cdiv(n, m) * m


def autoencoder_kernel(x_ref,
                       w1_ref, b1_ref,
                       w2_ref, b2_ref,
                       w3_ref, b3_ref,
                       w4_ref, b4_ref,
                       out_ref):
    """One batch tile: 4 MXU matmuls (bf16 in, f32 acc) + VPU ReLU / EUP sigmoid."""
    x = x_ref[...].astype(jnp.bfloat16)

    # Encoder
    h = jnp.dot(x, w1_ref[...], preferred_element_type=jnp.float32) + b1_ref[...]
    h = jnp.maximum(h, 0.0)
    h = jnp.dot(h.astype(jnp.bfloat16), w2_ref[...],
                preferred_element_type=jnp.float32) + b2_ref[...]
    h = jnp.maximum(h, 0.0)

    # Decoder
    h = jnp.dot(h.astype(jnp.bfloat16), w3_ref[...],
                preferred_element_type=jnp.float32) + b3_ref[...]
    h = jnp.maximum(h, 0.0)
    logits = jnp.dot(h.astype(jnp.bfloat16), w4_ref[...],
                     preferred_element_type=jnp.float32) + b4_ref[...]

    out_ref[...] = jax.nn.sigmoid(logits).astype(out_ref.dtype)


def autoencoder_forward(x, params, *, block_rows=4096):
    """x: (B, input_size) float32. params: (W1,b1,W2,b2,W3,b3,W4,b4),
    weights stored (in, out), biases (1, out)."""
    B, F = x.shape
    w1, b1, w2, b2, w3, b3, w4, b4 = params

    # ---- lane-density packing factor --------------------------------------
    PACK = (128 // F) if (F < 128 and 128 % F == 0) else 1
    lanes = F * PACK

    def pack_w(w):
        wp = w if PACK == 1 else jnp.kron(jnp.eye(PACK, dtype=w.dtype), w)
        return wp.astype(jnp.bfloat16)            # bf16 weights in HBM/VMEM

    def pack_b(b):
        return b if PACK == 1 else jnp.tile(b, (1, PACK))   # bias stays f32

    packed = (pack_w(w1), pack_b(b1), pack_w(w2), pack_b(b2),
              pack_w(w3), pack_b(b3), pack_w(w4), pack_b(b4))

    # ---- batch tiling -------------------------------------------------------
    row_align = 16 * PACK                         # bf16 sublane (16) x packing
    tb = min(block_rows, _round_up(B, row_align))
    tb = max(row_align, (tb // row_align) * row_align)   # multiple of row_align
    b_pad = _round_up(B, tb)
    grid = (b_pad // tb,)
    tbs = tb // PACK                              # slab rows per grid step

    if b_pad != B:
        x = jnp.pad(x, ((0, b_pad - B), (0, 0)))
    x_slab = x.reshape(b_pad // PACK, lanes)      # row-major fold: free in HBM

    # ---- specs --------------------------------------------------------------
    x_spec = pl.BlockSpec((tbs, lanes), lambda i: (i, 0))
    out_spec = pl.BlockSpec((tbs, lanes), lambda i: (i, 0))
    # Constant index_map -> weights/biases DMA'd once, resident across the grid.
    param_specs = [pl.BlockSpec(p.shape, lambda i: (0, 0)) for p in packed]

    # ---- cost estimate (advisory) -------------------------------------------
    n_slab_rows = b_pad // PACK
    h1, h2 = packed[0].shape[1], packed[2].shape[1]
    flops = 2 * n_slab_rows * (lanes * h1 + h1 * h2 + h2 * h1 + h1 * lanes)
    bytes_accessed = (x_slab.size * 4 + n_slab_rows * lanes * 4
                      + sum(int(p.size) * p.dtype.itemsize for p in packed))
    cost = pl.CostEstimate(flops=int(flops),
                           transcendentals=int(b_pad * F),
                           bytes_accessed=int(bytes_accessed))

    out_slab = pl.pallas_call(
        autoencoder_kernel,
        out_shape=jax.ShapeDtypeStruct((n_slab_rows, lanes), x.dtype),
        grid=grid,
        in_specs=[x_spec] + param_specs,
        out_specs=out_spec,
        compiler_params=pltpu.CompilerParams(
            dimension_semantics=("parallel",),          # v7x: 2 TCs split batch
            vmem_limit_bytes=32 * 1024 * 1024,          # safe on v5e/v6e/v7x
        ),
        cost_estimate=cost,
    )(x_slab, *packed)

    return out_slab.reshape(b_pad, F)[:B]


def init_params(key, input_size, encoding_dim=32, dtype=jnp.float32):
    """PyTorch-style uniform(-1/sqrt(fan_in), 1/sqrt(fan_in)).
    Weights stored as (in, out); biases as (1, out)."""
    dims = [
        (input_size, encoding_dim * 2),    # encoder L1
        (encoding_dim * 2, encoding_dim),  # encoder L2
        (encoding_dim, encoding_dim * 2),  # decoder L1
        (encoding_dim * 2, input_size),    # decoder L2
    ]
    params = []
    for (fan_in, fan_out) in dims:
        key, kw, kb = jax.random.split(key, 3)
        bound = 1.0 / (fan_in ** 0.5)
        w = jax.random.uniform(kw, (fan_in, fan_out), dtype, -bound, bound)
        b = jax.random.uniform(kb, (1, fan_out), dtype, -bound, bound)
        params += [w, b]
    return tuple(params)


def reference_forward(x, params):
    """Pure-JAX f32 reference for correctness check."""
    w1, b1, w2, b2, w3, b3, w4, b4 = params
    h = jnp.maximum(x @ w1 + b1, 0.0)
    h = jnp.maximum(h @ w2 + b2, 0.0)
    h = jnp.maximum(h @ w3 + b3, 0.0)
    return jax.nn.sigmoid(h @ w4 + b4)


if __name__ == "__main__":
    key = jax.random.PRNGKey(0)
    batch = 200           # not a multiple of the tile -> exercises padding path
    input_size = 16
    encoding_dim = 32

    key, kx, kp = jax.random.split(key, 3)
    x = jax.random.normal(kx, (batch, input_size), jnp.float32)
    params = init_params(kp, input_size, encoding_dim)

    # small block_rows so the test runs >1 grid step; production default is 4096
    fwd = jax.jit(functools.partial(autoencoder_forward, block_rows=128))
    out = jax.block_until_ready(fwd(x, params))

    ref = reference_forward(x, params)
    assert out.shape == (batch, input_size)
    # bf16 matmul operands -> loosen tolerance vs the f32 reference
    assert jnp.allclose(out, ref, atol=2e-2, rtol=2e-2), (
        f"mismatch vs JAX reference, max abs diff {jnp.max(jnp.abs(out - ref))}")

    print("KERNEL_OK")
</pallas_src>

<mosaic_0001>
module attributes {stable_mosaic.version = 11 : i64} {
  func.func @autoencoder_kernel(%arg0: i32, %arg1: memref<16x128xf32, #tpu.memory_space<vmem>>, %arg2: memref<128x512xbf16, #tpu.memory_space<vmem>>, %arg3: memref<1x512xf32, #tpu.memory_space<vmem>>, %arg4: memref<512x256xbf16, #tpu.memory_space<vmem>>, %arg5: memref<1x256xf32, #tpu.memory_space<vmem>>, %arg6: memref<256x512xbf16, #tpu.memory_space<vmem>>, %arg7: memref<1x512xf32, #tpu.memory_space<vmem>>, %arg8: memref<512x128xbf16, #tpu.memory_space<vmem>>, %arg9: memref<1x128xf32, #tpu.memory_space<vmem>>, %arg10: memref<16x128xf32, #tpu.memory_space<vmem>>) attributes {dimension_semantics = [#tpu.dimension_semantics<parallel>], iteration_bounds = array<i64: 2>, scalar_prefetch = 0 : i64, scratch_operands = 0 : i64, tpu.core_type = #tpu.core_type<tc>, window_params = [{transform_indices = @transform_0, window_bounds = array<i64: 16, 128>}, {pipeline_mode = #tpu.pipeline_mode<synchronous>, transform_indices = @transform_1, window_bounds = array<i64: 128, 512>}, {pipeline_mode = #tpu.pipeline_mode<synchronous>, transform_indices = @transform_2, window_bounds = array<i64: 1, 512>}, {pipeline_mode = #tpu.pipeline_mode<synchronous>, transform_indices = @transform_3, window_bounds = array<i64: 512, 256>}, {pipeline_mode = #tpu.pipeline_mode<synchronous>, transform_indices = @transform_4, window_bounds = array<i64: 1, 256>}, {pipeline_mode = #tpu.pipeline_mode<synchronous>, transform_indices = @transform_5, window_bounds = array<i64: 256, 512>}, {pipeline_mode = #tpu.pipeline_mode<synchronous>, transform_indices = @transform_6, window_bounds = array<i64: 1, 512>}, {pipeline_mode = #tpu.pipeline_mode<synchronous>, transform_indices = @transform_7, window_bounds = array<i64: 512, 128>}, {pipeline_mode = #tpu.pipeline_mode<synchronous>, transform_indices = @transform_8, window_bounds = array<i64: 1, 128>}, {transform_indices = @transform_9, window_bounds = array<i64: 16, 128>}]} {
    %c0 = arith.constant 0 : index
    %c0_0 = arith.constant 0 : index
    %0 = vector.load %arg1[%c0, %c0_0] : memref<16x128xf32, #tpu.memory_space<vmem>>, vector<16x128xf32>
    %1 = arith.truncf %0 : vector<16x128xf32> to vector<16x128xbf16>
    %c0_1 = arith.constant 0 : index
    %c0_2 = arith.constant 0 : index
    %2 = vector.load %arg2[%c0_1, %c0_2] : memref<128x512xbf16, #tpu.memory_space<vmem>>, vector<128x512xbf16>
    %cst = arith.constant dense<0.000000e+00> : vector<16x512xf32>
    %3 = tpu.matmul %1, %2, %cst {dimension_numbers = #tpu.dot_dimension_numbers<[1], [0], [0], [1], [0, 0, 1, 1], [], []>} : vector<16x128xbf16>, vector<128x512xbf16>, vector<16x512xf32> -> vector<16x512xf32>
    %c0_3 = arith.constant 0 : index
    %c0_4 = arith.constant 0 : index
    %4 = vector.load %arg3[%c0_3, %c0_4] : memref<1x512xf32, #tpu.memory_space<vmem>>, vector<1x512xf32>
    %5 = vector.broadcast %4 : vector<1x512xf32> to vector<16x512xf32>
    %6 = arith.addf %3, %5 : vector<16x512xf32>
    %cst_5 = arith.constant 0.000000e+00 : f32
    %7 = vector.broadcast %cst_5 : f32 to vector<16x512xf32>
    %8 = arith.maximumf %6, %7 : vector<16x512xf32>
    %9 = arith.truncf %8 : vector<16x512xf32> to vector<16x512xbf16>
    %c0_6 = arith.constant 0 : index
    %c0_7 = arith.constant 0 : index
    %10 = vector.load %arg4[%c0_6, %c0_7] : memref<512x256xbf16, #tpu.memory_space<vmem>>, vector<512x256xbf16>
    %cst_8 = arith.constant dense<0.000000e+00> : vector<16x256xf32>
    %11 = tpu.matmul %9, %10, %cst_8 {dimension_numbers = #tpu.dot_dimension_numbers<[1], [0], [0], [1], [0, 0, 1, 1], [], []>} : vector<16x512xbf16>, vector<512x256xbf16>, vector<16x256xf32> -> vector<16x256xf32>
    %c0_9 = arith.constant 0 : index
    %c0_10 = arith.constant 0 : index
    %12 = vector.load %arg5[%c0_9, %c0_10] : memref<1x256xf32, #tpu.memory_space<vmem>>, vector<1x256xf32>
    %13 = vector.broadcast %12 : vector<1x256xf32> to vector<16x256xf32>
    %14 = arith.addf %11, %13 : vector<16x256xf32>
    %cst_11 = arith.constant 0.000000e+00 : f32
    %15 = vector.broadcast %cst_11 : f32 to vector<16x256xf32>
    %16 = arith.maximumf %14, %15 : vector<16x256xf32>
    %17 = arith.truncf %16 : vector<16x256xf32> to vector<16x256xbf16>
    %c0_12 = arith.constant 0 : index
    %c0_13 = arith.constant 0 : index
    %18 = vector.load %arg6[%c0_12, %c0_13] : memref<256x512xbf16, #tpu.memory_space<vmem>>, vector<256x512xbf16>
    %cst_14 = arith.constant dense<0.000000e+00> : vector<16x512xf32>
    %19 = tpu.matmul %17, %18, %cst_14 {dimension_numbers = #tpu.dot_dimension_numbers<[1], [0], [0], [1], [0, 0, 1, 1], [], []>} : vector<16x256xbf16>, vector<256x512xbf16>, vector<16x512xf32> -> vector<16x512xf32>
    %c0_15 = arith.constant 0 : index
    %c0_16 = arith.constant 0 : index
    %20 = vector.load %arg7[%c0_15, %c0_16] : memref<1x512xf32, #tpu.memory_space<vmem>>, vector<1x512xf32>
    %21 = vector.broadcast %20 : vector<1x512xf32> to vector<16x512xf32>
    %22 = arith.addf %19, %21 : vector<16x512xf32>
    %cst_17 = arith.constant 0.000000e+00 : f32
    %23 = vector.broadcast %cst_17 : f32 to vector<16x512xf32>
    %24 = arith.maximumf %22, %23 : vector<16x512xf32>
    %25 = arith.truncf %24 : vector<16x512xf32> to vector<16x512xbf16>
    %c0_18 = arith.constant 0 : index
    %c0_19 = arith.constant 0 : index
    %26 = vector.load %arg8[%c0_18, %c0_19] : memref<512x128xbf16, #tpu.memory_space<vmem>>, vector<512x128xbf16>
    %cst_20 = arith.constant dense<0.000000e+00> : vector<16x128xf32>
    %27 = tpu.matmul %25, %26, %cst_20 {dimension_numbers = #tpu.dot_dimension_numbers<[1], [0], [0], [1], [0, 0, 1, 1], [], []>} : vector<16x512xbf16>, vector<512x128xbf16>, vector<16x128xf32> -> vector<16x128xf32>
    %c0_21 = arith.constant 0 : index
    %c0_22 = arith.constant 0 : index
    %28 = vector.load %arg9[%c0_21, %c0_22] : memref<1x128xf32, #tpu.memory_space<vmem>>, vector<1x128xf32>
    %29 = vector.broadcast %28 : vector<1x128xf32> to vector<16x128xf32>
    %30 = arith.addf %27, %29 : vector<16x128xf32>
    %31 = arith.negf %30 : vector<16x128xf32>
    %32 = math.exp %31 : vector<16x128xf32>
    %cst_23 = arith.constant 1.000000e+00 : f32
    %33 = vector.broadcast %cst_23 : f32 to vector<16x128xf32>
    %34 = arith.addf %33, %32 : vector<16x128xf32>
    %35 = arith.divf %33, %34 : vector<16x128xf32>
    %c0_24 = arith.constant 0 : index
    %c0_25 = arith.constant 0 : index
    %36 = vector.load %arg10[%c0_24, %c0_25] : memref<16x128xf32, #tpu.memory_space<vmem>>, vector<16x128xf32>
    tpu.vector_store %arg10[%c0_24, %c0_25], %35 {strides = array<i32>} : memref<16x128xf32, #tpu.memory_space<vmem>>, vector<16x128xf32>,
    return
  }
  func.func @transform_0(%arg0: i32) -> (i32, i32) {
    %c0_i32 = arith.constant 0 : i32
    %c0_i32_0 = arith.constant 0 : i32
    return %arg0, %c0_i32 : i32, i32
  }
  func.func @transform_1(%arg0: i32) -> (i32, i32) {
    %c0_i32 = arith.constant 0 : i32
    %c0_i32_0 = arith.constant 0 : i32
    %c0_i32_1 = arith.constant 0 : i32
    return %c0_i32, %c0_i32_0 : i32, i32
  }
  func.func @transform_2(%arg0: i32) -> (i32, i32) {
    %c0_i32 = arith.constant 0 : i32
    %c0_i32_0 = arith.constant 0 : i32
    %c0_i32_1 = arith.constant 0 : i32
    return %c0_i32, %c0_i32_0 : i32, i32
  }
  func.func @transform_3(%arg0: i32) -> (i32, i32) {
    %c0_i32 = arith.constant 0 : i32
    %c0_i32_0 = arith.constant 0 : i32
    %c0_i32_1 = arith.constant 0 : i32
    return %c0_i32, %c0_i32_0 : i32, i32
  }
  func.func @transform_4(%arg0: i32) -> (i32, i32) {
    %c0_i32 = arith.constant 0 : i32
    %c0_i32_0 = arith.constant 0 : i32
    %c0_i32_1 = arith.constant 0 : i32
    return %c0_i32, %c0_i32_0 : i32, i32
  }
  func.func @transform_5(%arg0: i32) -> (i32, i32) {
    %c0_i32 = arith.constant 0 : i32
    %c0_i32_0 = arith.constant 0 : i32
    %c0_i32_1 = arith.constant 0 : i32
    return %c0_i32, %c0_i32_0 : i32, i32
  }
  func.func @transform_6(%arg0: i32) -> (i32, i32) {
    %c0_i32 = arith.constant 0 : i32
    %c0_i32_0 = arith.constant 0 : i32
    %c0_i32_1 = arith.constant 0 : i32
    return %c0_i32, %c0_i32_0 : i32, i32
  }
  func.func @transform_7(%arg0: i32) -> (i32, i32) {
    %c0_i32 = arith.constant 0 : i32
    %c0_i32_0 = arith.constant 0 : i32
    %c0_i32_1 = arith.constant 0 : i32
    return %c0_i32, %c0_i32_0 : i32, i32
  }
  func.func @transform_8(%arg0: i32) -> (i32, i32) {
    %c0_i32 = arith.constant 0 : i32
    %c0_i32_0 = arith.constant 0 : i32
    %c0_i32_1 = arith.constant 0 : i32
    return %c0_i32, %c0_i32_0 : i32, i32
  }
  func.func @transform_9(%arg0: i32) -> (i32, i32) {
    %c0_i32 = arith.constant 0 : i32
    %c0_i32_0 = arith.constant 0 : i32
    return %arg0, %c0_i32 : i32, i32
  }
}

</mosaic_0001>

<bundles_post_ra>
// kernel: autoencoder_forward.1
= control target key start
LH: loop header
LB: loop body
LE: loop exit
PB: predicated region body
PF: predicated region fallthrough
CT: control target
= control target key end

     0   :  { %s3095_s30 = smov 0   ;;  %s4193_s0 = inlined_call_operand.vmem [shape: f32[32,128], index: 0, kind: input, shape index: {}]   ;;  %s4194_s1 = inlined_call_operand.vmem [shape: bf16[128,512], index: 1, kind: input, shape index: {}]   ;;  %s4195_s2 = inlined_call_operand.vmem [shape: f32[1,512], index: 2, kind: input, shape index: {}]   ;;  %s4196_s3 = inlined_call_operand.vmem [shape: bf16[512,256], index: 3, kind: input, shape index: {}]   ;;  %s4197_s4 = inlined_call_operand.vmem [shape: f32[1,256], index: 4, kind: input, shape index: {}]   ;;  %s4198_s5 = inlined_call_operand.vmem [shape: bf16[256,512], index: 5, kind: input, shape index: {}]   ;;  %s4199_s6 = inlined_call_operand.vmem [shape: f32[1,512], index: 6, kind: input, shape index: {}]   ;;  %s4200_s7 = inlined_call_operand.vmem [shape: bf16[512,128], index: 7, kind: input, shape index: {}]   ;;  %s4201_s8 = inlined_call_operand.vmem [shape: f32[1,128], index: 8, kind: input, shape index: {}]   ;;  %s4202_s9 = inlined_call_operand.vmem [shape: f32[32,128], index: 9, kind: output, shape index: {}]  }
   0x1 LB: > { %s2047_s10 = sadd.s32 4294967295, %s3043_s30   ;;  %p2051_p0 = scmp.ge.s32.totalorder %s3043_s30, 1  ;;  %s3043_s30 = sphi %s3095_s30, %s19_s30  }
   0x2   : > { %p288_p1 = scmp.lt.s32.totalorder %s3043_s30, 3 }
   0x4   : > { %p289_p2 = pnand %p2051_p0, %p288_p1 }
   0x5   : > { %s2052_s24 = sshll.u32 (!%p289_p2), %s2047_s10, 1 }
   0x6   : > { %292 = sbr.rel (%p289_p2) target bundleno = 690 (0x2b2), region = 56  ;;  %p325_p3 = scmp.lt.s32.totalorder (!%p289_p2), %s2052_s24, 3 }
   0xb   : > { %v2170_v0 = vld [vmem:[%s4194_s1 + $0xe0] sm:$0xf]  ;;  %v2858_v1 = vld [vmem:[%s4194_s1 + $0xec] sm:$0xf0]  ;;  %v2856_v2 = vld [vmem:[%s4194_s1 + $0xe4] sm:$0xf] }
   0xc   : > { %v2171_v3 = vor.u32 %v2858_v1, %v2170_v0  ;;  %v2172_v4 = vld [vmem:[%s4194_s1 + $0xf0] sm:$0xf0]  ;;  %v2178_v5 = vld [vmem:[%s4194_s1 + $0xe8] sm:$0xf]  ;;  %v2859_v6 = vld [vmem:[%s4194_s1 + $0xf4] sm:$0xf0] }
   0xd   : > { %v2175_v7 = vor.u32 %v2856_v2, %v2172_v4  ;;  %v2179_v8 = vor.u32 %v2859_v6, %v2178_v5  ;;  %v2857_v9 = vld [vmem:[%s4194_s1 + $0xec] sm:$0xf]  ;;  %v2180_v10 = vld [vmem:[%s4194_s1 + $0xf8] sm:$0xf0]  ;;  %v2154_v11 = vld [vmem:[%s4194_s1 + $0xc0] sm:$0xf] }
   0xe   : > { %541 = vmatpush.bf16.msra.mxu0 %v2171_v3  ;;  %v2183_v12 = vor.u32 %v2857_v9, %v2180_v10  ;;  %v2854_v13 = vld [vmem:[%s4194_s1 + $0xcc] sm:$0xf0]  ;;  %v2852_v14 = vld [vmem:[%s4194_s1 + $0xc4] sm:$0xf]  ;;  %v2156_v15 = vld [vmem:[%s4194_s1 + $0xd0] sm:$0xf0] }
   0xf   : > { %555 = vmatpush.bf16.msra.mxu1 %v2175_v7  ;;  %569 = vmatpush.bf16.msra.mxu2 %v2179_v8  ;;  %v2155_v16 = vor.u32 %v2854_v13, %v2154_v11  ;;  %v2159_v17 = vor.u32 %v2852_v14, %v2156_v15  ;;  %v2162_v18 = vld [vmem:[%s4194_s1 + $0xc8] sm:$0xf]  ;;  %v2855_v19 = vld [vmem:[%s4194_s1 + $0xd4] sm:$0xf0]  ;;  %v2853_v20 = vld [vmem:[%s4194_s1 + $0xcc] sm:$0xf] }
  0x10   : > { %583 = vmatpush.bf16.msra.mxu3 %v2183_v12  ;;  %v2163_v21 = vor.u32 %v2855_v19, %v2162_v18  ;;  %v2164_v22 = vld [vmem:[%s4194_s1 + $0xd8] sm:$0xf0]  ;;  %v2138_v23 = vld [vmem:[%s4194_s1 + $0xa0] sm:$0xf]  ;;  %v2850_v24 = vld [vmem:[%s4194_s1 + $0xac] sm:$0xf0] }
  0x11   : > { %v2167_v25 = vor.u32 %v2853_v20, %v2164_v22  ;;  %v2848_v26 = vld [vmem:[%s4194_s1 + $0xa4] sm:$0xf]  ;;  %v2140_v27 = vld [vmem:[%s4194_s1 + $0xb0] sm:$0xf0]  ;;  %v2146_v28 = vld [vmem:[%s4194_s1 + $0xa8] sm:$0xf]  ;;  %v2139_v29 = vor.u32 %v2850_v24, %v2138_v23 }
  0x12   : > { %542 = vmatpush.bf16.msra.mxu0 %v2155_v16  ;;  %v2851_v30 = vld [vmem:[%s4194_s1 + $0xb4] sm:$0xf0]  ;;  %v2849_v31 = vld [vmem:[%s4194_s1 + $0xac] sm:$0xf]  ;;  %v2148_v32 = vld [vmem:[%s4194_s1 + $0xb8] sm:$0xf0]  ;;  %v2143_v33 = vor.u32 %v2848_v26, %v2140_v27 }
  0x13   : > { %556 = vmatpush.bf16.msra.mxu1 %v2159_v17  ;;  %570 = vmatpush.bf16.msra.mxu2 %v2163_v21  ;;  %v2147_v34 = vor.u32 %v2851_v30, %v2146_v28  ;;  %v2122_v35 = vld [vmem:[%s4194_s1 + $0x80] sm:$0xf]  ;;  %v2846_v36 = vld [vmem:[%s4194_s1 + $0x8c] sm:$0xf0]  ;;  %v2844_v37 = vld [vmem:[%s4194_s1 + $0x84] sm:$0xf]  ;;  %v2151_v38 = vor.u32 %v2849_v31, %v2148_v32 }
  0x14   : > { %584 = vmatpush.bf16.msra.mxu3 %v2167_v25  ;;  %v2124_v39 = vld [vmem:[%s4194_s1 + $0x90] sm:$0xf0]  ;;  %v2130_v40 = vld [vmem:[%s4194_s1 + $0x88] sm:$0xf]  ;;  %v2847_v41 = vld [vmem:[%s4194_s1 + $0x94] sm:$0xf0]  ;;  %v2123_v44 = vor.u32 %v2846_v36, %v2122_v35 }
  0x15   : > { %v2845_v42 = vld [vmem:[%s4194_s1 + $0x8c] sm:$0xf]  ;;  %v2132_v43 = vld [vmem:[%s4194_s1 + $0x98] sm:$0xf0]  ;;  %v2127_v45 = vor.u32 %v2844_v37, %v2124_v39  ;;  %v2131_v46 = vor.u32 %v2847_v41, %v2130_v40  ;;  %v2106_v47 = vld [vmem:[%s4194_s1 + $0x60] sm:$0xf] }
  0x16   : > { %543 = vmatpush.bf16.msra.mxu0 %v2139_v29  ;;  %v2842_v48 = vld [vmem:[%s4194_s1 + $0x6c] sm:$0xf0]  ;;  %v2840_v49 = vld [vmem:[%s4194_s1 + $0x64] sm:$0xf]  ;;  %v2135_v50 = vor.u32 %v2845_v42, %v2132_v43  ;;  %v2108_v51 = vld [vmem:[%s4194_s1 + $0x70] sm:$0xf0] }
  0x17   : > { %557 = vmatpush.bf16.msra.mxu1 %v2143_v33  ;;  %571 = vmatpush.bf16.msra.mxu2 %v2147_v34  ;;  %v2114_v52 = vld [vmem:[%s4194_s1 + $0x68] sm:$0xf]  ;;  %v2843_v53 = vld [vmem:[%s4194_s1 + $0x74] sm:$0xf0]  ;;  %v2841_v54 = vld [vmem:[%s4194_s1 + $0x6c] sm:$0xf]  ;;  %v2107_v56 = vor.u32 %v2842_v48, %v2106_v47  ;;  %v2111_v57 = vor.u32 %v2840_v49, %v2108_v51 }
  0x18   : > { %585 = vmatpush.bf16.msra.mxu3 %v2151_v38  ;;  %v2116_v55 = vld [vmem:[%s4194_s1 + $0x78] sm:$0xf0]  ;;  %v2115_v58 = vor.u32 %v2843_v53, %v2114_v52  ;;  %v2090_v59 = vld [vmem:[%s4194_s1 + $0x40] sm:$0xf]  ;;  %v2838_v60 = vld [vmem:[%s4194_s1 + $0x4c] sm:$0xf0] }
  0x19   : > { %v2836_v61 = vld [vmem:[%s4194_s1 + $0x44] sm:$0xf]  ;;  %v2119_v62 = vor.u32 %v2841_v54, %v2116_v55  ;;  %v2092_v63 = vld [vmem:[%s4194_s1 + $0x50] sm:$0xf0]  ;;  %v2098_v0 = vld [vmem:[%s4194_s1 + $0x48] sm:$0xf]  ;;  %v2091_v4 = vor.u32 %v2838_v60, %v2090_v59 }
  0x1a   : > { %544 = vmatpush.bf16.msra.mxu0 %v2123_v44  ;;  %v2839_v1 = vld [vmem:[%s4194_s1 + $0x54] sm:$0xf0]  ;;  %v2837_v2 = vld [vmem:[%s4194_s1 + $0x4c] sm:$0xf]  ;;  %v2100_v3 = vld [vmem:[%s4194_s1 + $0x58] sm:$0xf0]  ;;  %v2095_v6 = vor.u32 %v2836_v61, %v2092_v63 }
  0x1b   : > { %558 = vmatpush.bf16.msra.mxu1 %v2127_v45  ;;  %572 = vmatpush.bf16.msra.mxu2 %v2131_v46  ;;  %v2074_v5 = vld [vmem:[%s4194_s1 + $0x20] sm:$0xf]  ;;  %v2099_v7 = vor.u32 %v2839_v1, %v2098_v0  ;;  %v2834_v8 = vld [vmem:[%s4194_s1 + $0x2c] sm:$0xf0]  ;;  %v2832_v9 = vld [vmem:[%s4194_s1 + $0x24] sm:$0xf]  ;;  %v2103_v11 = vor.u32 %v2837_v2, %v2100_v3 }
  0x1c   : > { %586 = vmatpush.bf16.msra.mxu3 %v2135_v50  ;;  %v2076_v10 = vld [vmem:[%s4194_s1 + $0x30] sm:$0xf0]  ;;  %v2082_v12 = vld [vmem:[%s4194_s1 + $0x28] sm:$0xf]  ;;  %v2835_v13 = vld [vmem:[%s4194_s1 + $0x34] sm:$0xf0]  ;;  %v2075_v16 = vor.u32 %v2834_v8, %v2074_v5 }
  0x1d   : > { %v2833_v14 = vld [vmem:[%s4194_s1 + $0x2c] sm:$0xf]  ;;  %v2084_v15 = vld [vmem:[%s4194_s1 + $0x38] sm:$0xf0]  ;;  %v2058_v17 = vld [vmem:[%s4194_s1] sm:$0xf]  ;;  %v2079_v20 = vor.u32 %v2832_v9, %v2076_v10  ;;  %v2083_v21 = vor.u32 %v2835_v13, %v2082_v12 }
  0x1e   : > { %545 = vmatpush.bf16.msra.mxu0 %v2107_v56  ;;  %v2830_v18 = vld [vmem:[%s4194_s1 + $0xc] sm:$0xf0]  ;;  %v2828_v19 = vld [vmem:[%s4194_s1 + $0x4] sm:$0xf]  ;;  %v2060_v22 = vld [vmem:[%s4194_s1 + $0x10] sm:$0xf0]  ;;  %v2087_v24 = vor.u32 %v2833_v14, %v2084_v15 }
  0x1f   : > { %559 = vmatpush.bf16.msra.mxu1 %v2111_v57  ;;  %573 = vmatpush.bf16.msra.mxu2 %v2115_v58  ;;  %v2066_v23 = vld [vmem:[%s4194_s1 + $0x8] sm:$0xf]  ;;  %s4204_s24 = smov (!%p325_p3, %s2052_s24), 3  ;;  %v2831_v25 = vld [vmem:[%s4194_s1 + $0x14] sm:$0xf0]  ;;  %v2059_v30 = vor.u32 %v2830_v18, %v2058_v17  ;;  %v2063_v33 = vor.u32 %v2828_v19, %v2060_v22 }
  0x20   : > { %587 = vmatpush.bf16.msra.mxu3 %v2119_v62  ;;  %v2829_v26 = vld [vmem:[%s4194_s1 + $0xc] sm:$0xf]  ;;  %v2068_v27 = vld [vmem:[%s4194_s1 + $0x18] sm:$0xf0]  ;;  %s2053_s26 = sshll.u32 %s4204_s24, 3  ;;  %v2067_v34 = vor.u32 %v2831_v25, %v2066_v23 }
  0x21   : > { %v2242_v28 = vld [vmem:[%s4196_s3 + $0x70] sm:$0xf]  ;;  %v2875_v29 = vld [vmem:[%s4196_s3 + $0x74] sm:$0xf0]  ;;  %s328_s10 = scalar_lea.vmem %s4193_s0, %s2053_s26  ;;  %v2071_v37 = vor.u32 %v2829_v26, %v2068_v27  ;;  %v2234_v39 = vld [vmem:[%s4196_s3 + $0x60] sm:$0xf]  ;;  %s334_s20 = scalar_lea.vmem %s4202_s9, %s2053_s26 }
  0x22   : > { %546 = vmatpush.bf16.msra.mxu0 %v2091_v4  ;;  %v2306_v31 = vld [vmem:[%s4196_s3 + $0xf0] sm:$0xf]  ;;  %v2891_v32 = vld [vmem:[%s4196_s3 + $0xf4] sm:$0xf0]  ;;  %v336_v35 = vld [vmem:[%s328_s10] sm:$0xff]  ;;  %v2243_v38 = vor.u32 %v2875_v29, %v2242_v28 }
  0x23   : > { %560 = vmatpush.bf16.msra.mxu1 %v2095_v6  ;;  %574 = vmatpush.bf16.msra.mxu2 %v2099_v7  ;;  %v337_v36 = vld [vmem:[%s328_s10 + $0x8] sm:$0xff]  ;;  %v2370_v40 = vld [vmem:[%s4196_s3 + $0x170] sm:$0xf]  ;;  %v2907_v41 = vld [vmem:[%s4196_s3 + $0x174] sm:$0xf0]  ;;  %v2307_v43 = vor.u32 %v2891_v32, %v2306_v31 }
  0x24   : > { %588 = vmatpush.bf16.msra.mxu3 %v2103_v11  ;;  %v338_v42 = vpack.c.bf16 %v337_v36, %v336_v35  ;;  %v2873_v44 = vld [vmem:[%s4196_s3 + $0x64] sm:$0xf0]  ;;  %v2434_v45 = vld [vmem:[%s4196_s3 + $0x1f0] sm:$0xf]  ;;  %v2923_v46 = vld [vmem:[%s4196_s3 + $0x1f4] sm:$0xf0]  ;;  %v2371_v49 = vor.u32 %v2907_v41, %v2370_v40 }
  0x25   : > { %v2298_v47 = vld [vmem:[%s4196_s3 + $0xe0] sm:$0xf]  ;;  %v2889_v48 = vld [vmem:[%s4196_s3 + $0xe4] sm:$0xf0]  ;;  %v2235_v50 = vor.u32 %v2873_v44, %v2234_v39  ;;  %v2435_v51 = vor.u32 %v2923_v46, %v2434_v45  ;;  %v2226_v52 = vld [vmem:[%s4196_s3 + $0x50] sm:$0xf] }
  0x26   : > { %547 = vmatpush.bf16.msra.mxu0 %v2075_v16  ;;  %v2362_v53 = vld [vmem:[%s4196_s3 + $0x160] sm:$0xf]  ;;  %v2905_v54 = vld [vmem:[%s4196_s3 + $0x164] sm:$0xf0]  ;;  %v2299_v55 = vor.u32 %v2889_v48, %v2298_v47  ;;  %v2871_v56 = vld [vmem:[%s4196_s3 + $0x54] sm:$0xf0] }
  0x27   : > { %561 = vmatpush.bf16.msra.mxu1 %v2079_v20  ;;  %575 = vmatpush.bf16.msra.mxu2 %v2083_v21  ;;  %v2426_v57 = vld [vmem:[%s4196_s3 + $0x1e0] sm:$0xf]  ;;  %v2921_v58 = vld [vmem:[%s4196_s3 + $0x1e4] sm:$0xf0]  ;;  %v2290_v59 = vld [vmem:[%s4196_s3 + $0xd0] sm:$0xf]  ;;  %v2363_v61 = vor.u32 %v2905_v54, %v2362_v53  ;;  %v2227_v62 = vor.u32 %v2871_v56, %v2226_v52 }
  0x28   : > { %589 = vmatpush.bf16.msra.mxu3 %v2087_v24  ;;  %v2887_v60 = vld [vmem:[%s4196_s3 + $0xd4] sm:$0xf0]  ;;  %v2427_v63 = vor.u32 %v2921_v58, %v2426_v57  ;;  %v2218_v0 = vld [vmem:[%s4196_s3 + $0x40] sm:$0xf]  ;;  %v2354_v1 = vld [vmem:[%s4196_s3 + $0x150] sm:$0xf] }
  0x29   : > { %v2903_v2 = vld [vmem:[%s4196_s3 + $0x154] sm:$0xf0]  ;;  %v2291_v3 = vor.u32 %v2887_v60, %v2290_v59  ;;  %v2869_v4 = vld [vmem:[%s4196_s3 + $0x44] sm:$0xf0]  ;;  %v2418_v5 = vld [vmem:[%s4196_s3 + $0x1d0] sm:$0xf] }
  0x2a   : > { %548 = vmatpush.bf16.msra.mxu0 %v2059_v30  ;;  %v2919_v6 = vld [vmem:[%s4196_s3 + $0x1d4] sm:$0xf0]  ;;  %v2282_v7 = vld [vmem:[%s4196_s3 + $0xc0] sm:$0xf]  ;;  %v2885_v8 = vld [vmem:[%s4196_s3 + $0xc4] sm:$0xf0]  ;;  %v2355_v9 = vor.u32 %v2903_v2, %v2354_v1  ;;  %v2219_v11 = vor.u32 %v2869_v4, %v2218_v0 }
  0x2b   : > { %562 = vmatpush.bf16.msra.mxu1 %v2063_v33  ;;  %576 = vmatpush.bf16.msra.mxu2 %v2067_v34  ;;  %v2210_v10 = vld [vmem:[%s4196_s3 + $0x30] sm:$0xf]  ;;  %v2419_v12 = vor.u32 %v2919_v6, %v2418_v5  ;;  %v2867_v13 = vld [vmem:[%s4196_s3 + $0x34] sm:$0xf0]  ;;  %v2346_v14 = vld [vmem:[%s4196_s3 + $0x140] sm:$0xf]  ;;  %v2283_v16 = vor.u32 %v2885_v8, %v2282_v7 }
  0x2c   : > { %590 = vmatpush.bf16.msra.mxu3 %v2071_v37  ;;  %v2901_v15 = vld [vmem:[%s4196_s3 + $0x144] sm:$0xf0]  ;;  %v2410_v17 = vld [vmem:[%s4196_s3 + $0x1c0] sm:$0xf]  ;;  %v2274_v19 = vld [vmem:[%s4196_s3 + $0xb0] sm:$0xf]  ;;  %v2211_v22 = vor.u32 %v2867_v13, %v2210_v10 }
  0x2d   : > { %549 = vmatmul.bf16.vlgmr.msra.gmra.mxu0 %v338_v42  ;;  %v2917_v18 = vld [vmem:[%s4196_s3 + $0x1c4] sm:$0xf0]  ;;  %v2883_v20 = vld [vmem:[%s4196_s3 + $0xb4] sm:$0xf0]  ;;  %v2347_v21 = vor.u32 %v2901_v15, %v2346_v14  ;;  %v2202_v24 = vld [vmem:[%s4196_s3 + $0x20] sm:$0xf] }
  0x2e   : > { %999 = vmatpush.bf16.msrb.mxu0 %v2243_v38  ;;  %563 = vmatmul.bf16.vlgmr.msra.gmra.mxu1 %v338_v42  ;;  %v2411_v23 = vor.u32 %v2917_v18, %v2410_v17  ;;  %v2338_v25 = vld [vmem:[%s4196_s3 + $0x130] sm:$0xf]  ;;  %v2899_v26 = vld [vmem:[%s4196_s3 + $0x134] sm:$0xf0]  ;;  %v2275_v27 = vor.u32 %v2883_v20, %v2274_v19  ;;  %v2865_v28 = vld [vmem:[%s4196_s3 + $0x24] sm:$0xf0] }
  0x2f   : > { %1013 = vmatpush.bf16.msrb.mxu1 %v2307_v43  ;;  %577 = vmatmul.bf16.vlgmr.msra.gmra.mxu2 %v338_v42  ;;  %v2402_v29 = vld [vmem:[%s4196_s3 + $0x1b0] sm:$0xf]  ;;  %v2915_v30 = vld [vmem:[%s4196_s3 + $0x1b4] sm:$0xf0]  ;;  %v2266_v31 = vld [vmem:[%s4196_s3 + $0xa0] sm:$0xf]  ;;  %v2339_v33 = vor.u32 %v2899_v26, %v2338_v25  ;;  %v2203_v34 = vor.u32 %v2865_v28, %v2202_v24 }
  0x30   : > { %591 = vmatmul.bf16.vlgmr.msra.gmra.mxu3 %v338_v42  ;;  %1027 = vmatpush.bf16.msrb.mxu2 %v2371_v49  ;;  %v2881_v32 = vld [vmem:[%s4196_s3 + $0xa4] sm:$0xf0]  ;;  %v2403_v35 = vor.u32 %v2915_v30, %v2402_v29  ;;  %v2194_v36 = vld [vmem:[%s4196_s3 + $0x10] sm:$0xf]  ;;  %v2330_v37 = vld [vmem:[%s4196_s3 + $0x120] sm:$0xf] }
  0x31   : > { %1041 = vmatpush.bf16.msrb.mxu3 %v2435_v51  ;;  %v2897_v38 = vld [vmem:[%s4196_s3 + $0x124] sm:$0xf0]  ;;  %v2267_v39 = vor.u32 %v2881_v32, %v2266_v31  ;;  %v2863_v40 = vld [vmem:[%s4196_s3 + $0x14] sm:$0xf0]  ;;  %v2394_v41 = vld [vmem:[%s4196_s3 + $0x1a0] sm:$0xf] }
  0x32   : > { %1000 = vmatpush.bf16.msrb.mxu0 %v2235_v50  ;;  %v2913_v42 = vld [vmem:[%s4196_s3 + $0x1a4] sm:$0xf0]  ;;  %v2258_v43 = vld [vmem:[%s4196_s3 + $0x90] sm:$0xf]  ;;  %v2879_v44 = vld [vmem:[%s4196_s3 + $0x94] sm:$0xf0]  ;;  %v2331_v45 = vor.u32 %v2897_v38, %v2330_v37  ;;  %v2195_v46 = vor.u32 %v2863_v40, %v2194_v36 }
  0x33   : > { %1014 = vmatpush.bf16.msrb.mxu1 %v2299_v55  ;;  %v2395_v47 = vor.u32 %v2913_v42, %v2394_v41  ;;  %v2259_v48 = vor.u32 %v2879_v44, %v2258_v43  ;;  %v2186_v49 = vld [vmem:[%s4196_s3] sm:$0xf]  ;;  %v2861_v50 = vld [vmem:[%s4196_s3 + $0x4] sm:$0xf0]  ;;  %v2874_v55 = vld [vmem:[%s4196_s3 + $0x74] sm:$0xf] }
  0x34   : > { %1028 = vmatpush.bf16.msrb.mxu2 %v2363_v61  ;;  %v2250_v51 = vld [vmem:[%s4196_s3 + $0x80] sm:$0xf]  ;;  %v2877_v52 = vld [vmem:[%s4196_s3 + $0x84] sm:$0xf0]  ;;  %v2187_v53 = vor.u32 %v2861_v50, %v2186_v49  ;;  %v2244_v56 = vld [vmem:[%s4196_s3 + $0x78] sm:$0xf0] }
  0x35   : > { %1042 = vmatpush.bf16.msrb.mxu3 %v2427_v63  ;;  %v2251_v54 = vor.u32 %v2877_v52, %v2250_v51  ;;  %v2890_v57 = vld [vmem:[%s4196_s3 + $0xf4] sm:$0xf]  ;;  %v2247_v58 = vor.u32 %v2874_v55, %v2244_v56  ;;  %v2308_v59 = vld [vmem:[%s4196_s3 + $0xf8] sm:$0xf0]  ;;  %v2322_v60 = vld [vmem:[%s4196_s3 + $0x110] sm:$0xf] }
  0x36   : > { %1001 = vmatpush.bf16.msrb.mxu0 %v2227_v62  ;;  %v2895_v61 = vld [vmem:[%s4196_s3 + $0x114] sm:$0xf0]  ;;  %v2311_v62 = vor.u32 %v2890_v57, %v2308_v59  ;;  %v2386_v0 = vld [vmem:[%s4196_s3 + $0x190] sm:$0xf]  ;;  %v2236_v4 = vld [vmem:[%s4196_s3 + $0x68] sm:$0xf0] }
  0x37   : > { %1015 = vmatpush.bf16.msrb.mxu1 %v2291_v3  ;;  %v2323_v63 = vor.u32 %v2895_v61, %v2322_v60  ;;  %v2911_v1 = vld [vmem:[%s4196_s3 + $0x194] sm:$0xf0]  ;;  %v2872_v3 = vld [vmem:[%s4196_s3 + $0x64] sm:$0xf]  ;;  %v2300_v7 = vld [vmem:[%s4196_s3 + $0xe8] sm:$0xf0] }
  0x38   : > { %1029 = vmatpush.bf16.msrb.mxu2 %v2355_v9  ;;  %v2387_v2 = vor.u32 %v2911_v1, %v2386_v0  ;;  %v2239_v5 = vor.u32 %v2872_v3, %v2236_v4  ;;  %v2888_v6 = vld [vmem:[%s4196_s3 + $0xe4] sm:$0xf]  ;;  %v2314_v8 = vld [vmem:[%s4196_s3 + $0x100] sm:$0xf]  ;;  %v2893_v10 = vld [vmem:[%s4196_s3 + $0x104] sm:$0xf0] }
  0x39   : > { %1043 = vmatpush.bf16.msrb.mxu3 %v2419_v12  ;;  %v2303_v9 = vor.u32 %v2888_v6, %v2300_v7  ;;  %v2909_v12 = vld [vmem:[%s4196_s3 + $0x184] sm:$0xf0]  ;;  %v2315_v13 = vor.u32 %v2893_v10, %v2314_v8  ;;  %v2906_v15 = vld [vmem:[%s4196_s3 + $0x174] sm:$0xf]  ;;  %v2436_v19 = vld [vmem:[%s4196_s3 + $0x1f8] sm:$0xf0] }
  0x3a   : > { %1002 = vmatpush.bf16.msrb.mxu0 %v2219_v11  ;;  %v2378_v11 = vld [vmem:[%s4196_s3 + $0x180] sm:$0xf]  ;;  %v2922_v18 = vld [vmem:[%s4196_s3 + $0x1f4] sm:$0xf]  ;;  %v2292_v24 = vld [vmem:[%s4196_s3 + $0xd8] sm:$0xf0] }
  0x3b   : > { %1016 = vmatpush.bf16.msrb.mxu1 %v2283_v16  ;;  %v2379_v14 = vor.u32 %v2909_v12, %v2378_v11  ;;  %v2372_v16 = vld [vmem:[%s4196_s3 + $0x178] sm:$0xf0]  ;;  %v2870_v20 = vld [vmem:[%s4196_s3 + $0x54] sm:$0xf]  ;;  %v2364_v28 = vld [vmem:[%s4196_s3 + $0x168] sm:$0xf0] }
  0x3c   : > { %1030 = vmatpush.bf16.msrb.mxu2 %v2347_v21  ;;  %v2375_v17 = vor.u32 %v2906_v15, %v2372_v16  ;;  %v2439_v21 = vor.u32 %v2922_v18, %v2436_v19  ;;  %v2920_v30 = vld [vmem:[%s4196_s3 + $0x1e4] sm:$0xf]  ;;  %v2428_v31 = vld [vmem:[%s4196_s3 + $0x1e8] sm:$0xf0]  ;;  %v2356_v40 = vld [vmem:[%s4196_s3 + $0x158] sm:$0xf0] }
  0x3d   : > { %1044 = vmatpush.bf16.msrb.mxu3 %v2411_v23  ;;  %v2886_v23 = vld [vmem:[%s4196_s3 + $0xd4] sm:$0xf]  ;;  %v2431_v32 = vor.u32 %v2920_v30, %v2428_v31  ;;  %v2284_v37 = vld [vmem:[%s4196_s3 + $0xc8] sm:$0xf0]  ;;  %v2420_v43 = vld [vmem:[%s4196_s3 + $0x1d8] sm:$0xf0] }
  0x3e   : > { %1003 = vmatpush.bf16.msrb.mxu0 %v2211_v22  ;;  %v2228_v22 = vld [vmem:[%s4196_s3 + $0x58] sm:$0xf0]  ;;  %v2295_v26 = vor.u32 %v2886_v23, %v2292_v24  ;;  %v2918_v41 = vld [vmem:[%s4196_s3 + $0x1d4] sm:$0xf]  ;;  %v2900_v51 = vld [vmem:[%s4196_s3 + $0x144] sm:$0xf] }
  0x3f   : > { %1017 = vmatpush.bf16.msrb.mxu1 %v2275_v27  ;;  %v2231_v25 = vor.u32 %v2870_v20, %v2228_v22  ;;  %v2904_v27 = vld [vmem:[%s4196_s3 + $0x164] sm:$0xf]  ;;  %v2423_v44 = vor.u32 %v2918_v41, %v2420_v43  ;;  %v2276_v49 = vld [vmem:[%s4196_s3 + $0xb8] sm:$0xf0]  ;;  %v2348_v52 = vld [vmem:[%s4196_s3 + $0x148] sm:$0xf0] }
  0x40   : > { %1031 = vmatpush.bf16.msrb.mxu2 %v2339_v33  ;;  %v2367_v29 = vor.u32 %v2904_v27, %v2364_v28  ;;  %v2868_v33 = vld [vmem:[%s4196_s3 + $0x44] sm:$0xf]  ;;  %v2412_v55 = vld [vmem:[%s4196_s3 + $0x1c8] sm:$0xf0]  ;;  %v2340_v0 = vld [vmem:[%s4196_s3 + $0x138] sm:$0xf0] }
  0x41   : > { %1045 = vmatpush.bf16.msrb.mxu3 %v2403_v35  ;;  %v2884_v35 = vld [vmem:[%s4196_s3 + $0xc4] sm:$0xf]  ;;  %v2268_v61 = vld [vmem:[%s4196_s3 + $0xa8] sm:$0xf0]  ;;  %v2914_v1 = vld [vmem:[%s4196_s3 + $0x1b4] sm:$0xf] }
  0x42   : > { %1004 = vmatpush.bf16.msrb.mxu0 %v2203_v34  ;;  %v2220_v34 = vld [vmem:[%s4196_s3 + $0x48] sm:$0xf0]  ;;  %v2287_v38 = vor.u32 %v2884_v35, %v2284_v37  ;;  %v2864_v57 = vld [vmem:[%s4196_s3 + $0x24] sm:$0xf]  ;;  %v2404_v3 = vld [vmem:[%s4196_s3 + $0x1b8] sm:$0xf0] }
  0x43   : > { %1018 = vmatpush.bf16.msrb.mxu1 %v2267_v39  ;;  %v2223_v36 = vor.u32 %v2868_v33, %v2220_v34  ;;  %v2902_v39 = vld [vmem:[%s4196_s3 + $0x154] sm:$0xf]  ;;  %v2880_v59 = vld [vmem:[%s4196_s3 + $0xa4] sm:$0xf]  ;;  %v2407_v4 = vor.u32 %v2914_v1, %v2404_v3  ;;  %v2196_v6 = vld [vmem:[%s4196_s3 + $0x18] sm:$0xf0] }
  0x44   : > { %1032 = vmatpush.bf16.msrb.mxu2 %v2331_v45  ;;  %v2359_v42 = vor.u32 %v2902_v39, %v2356_v40  ;;  %v2866_v45 = vld [vmem:[%s4196_s3 + $0x34] sm:$0xf]  ;;  %v2896_v10 = vld [vmem:[%s4196_s3 + $0x124] sm:$0xf]  ;;  %v2332_v11 = vld [vmem:[%s4196_s3 + $0x128] sm:$0xf0] }
  0x45   : > { %1046 = vmatpush.bf16.msrb.mxu3 %v2395_v47  ;;  %v2882_v47 = vld [vmem:[%s4196_s3 + $0xb4] sm:$0xf]  ;;  %v2396_v15 = vld [vmem:[%s4196_s3 + $0x1a8] sm:$0xf0]  ;;  %v2860_v16 = vld [vmem:[%s4196_s3 + $0x4] sm:$0xf] }
  0x46   : > { %1005 = vmatpush.bf16.msrb.mxu0 %v2195_v46  ;;  %v2212_v46 = vld [vmem:[%s4196_s3 + $0x38] sm:$0xf0]  ;;  %v2279_v50 = vor.u32 %v2882_v47, %v2276_v49  ;;  %v2878_v7 = vld [vmem:[%s4196_s3 + $0x94] sm:$0xf]  ;;  %v2188_v18 = vld [vmem:[%s4196_s3 + $0x8] sm:$0xf0] }
  0x47   : > { %1019 = vmatpush.bf16.msrb.mxu1 %v2259_v48  ;;  %v2215_v48 = vor.u32 %v2866_v45, %v2212_v46  ;;  %v2876_v19 = vld [vmem:[%s4196_s3 + $0x84] sm:$0xf]  ;;  %v2252_v20 = vld [vmem:[%s4196_s3 + $0x88] sm:$0xf0]  ;;  %v2894_v23 = vld [vmem:[%s4196_s3 + $0x114] sm:$0xf] }
  0x48   : > { %1033 = vmatpush.bf16.msrb.mxu2 %v2323_v63  ;;  %v2898_v63 = vld [vmem:[%s4196_s3 + $0x134] sm:$0xf]  ;;  %v2255_v22 = vor.u32 %v2876_v19, %v2252_v20  ;;  %v2324_v24 = vld [vmem:[%s4196_s3 + $0x118] sm:$0xf0]  ;;  %v2892_v31 = vld [vmem:[%s4196_s3 + $0x104] sm:$0xf] }
  0x49   : > { %1047 = vmatpush.bf16.msrb.mxu3 %v2387_v2  ;;  %v2343_v2 = vor.u32 %v2898_v63, %v2340_v0  ;;  %v2327_v27 = vor.u32 %v2894_v23, %v2324_v24  ;;  %v2908_v33 = vld [vmem:[%s4196_s3 + $0x184] sm:$0xf]  ;;  %v2380_v37 = vld [vmem:[%s4196_s3 + $0x188] sm:$0xf0]  ;;  %v2954_v49 = vld [vmem:[%s4198_s5 + $0xec] sm:$0xf0] }
  0x4a   : > { %1006 = vmatpush.bf16.msrb.mxu0 %v2187_v53  ;;  %v2916_v53 = vld [vmem:[%s4196_s3 + $0x1c4] sm:$0xf]  ;;  %v2383_v39 = vor.u32 %v2908_v33, %v2380_v37  ;;  %v2556_v3 = vld [vmem:[%s4198_s5 + $0xf0] sm:$0xf0]  ;;  %v2942_v19 = vld [vmem:[%s4198_s5 + $0x8c] sm:$0xf0] }
  0x4b   : > { %1020 = vmatpush.bf16.msrb.mxu1 %v2251_v54  ;;  %v2351_v54 = vor.u32 %v2900_v51, %v2348_v52  ;;  %v2415_v56 = vor.u32 %v2916_v53, %v2412_v55  ;;  %v2936_v33 = vld [vmem:[%s4198_s5 + $0x64] sm:$0xf] }
  0x4c   : > { %1034 = vmatpush.bf16.msrb.mxu2 %v2315_v13  ;;  %v2335_v13 = vor.u32 %v2896_v10, %v2332_v11  ;;  %v2984_v37 = vld [vmem:[%s4198_s5 + $0x1e4] sm:$0xf] }
  0x4d   : > { %1048 = vmatpush.bf16.msrb.mxu3 %v2379_v14  ;;  %v2912_v14 = vld [vmem:[%s4196_s3 + $0x1a4] sm:$0xf] }
  0x4e   : > { %1055 = vmatpush.bf16.msra.mxu0 %v2247_v58  ;;  %v2204_v58 = vld [vmem:[%s4196_s3 + $0x28] sm:$0xf0] }
  0x4f   : > { %1069 = vmatpush.bf16.msra.mxu1 %v2311_v62  ;;  %v2207_v60 = vor.u32 %v2864_v57, %v2204_v58  ;;  %v2271_v62 = vor.u32 %v2880_v59, %v2268_v61  ;;  %v2538_v58 = vld [vmem:[%s4198_s5 + $0xc0] sm:$0xf]  ;;  %v2950_v59 = vld [vmem:[%s4198_s5 + $0xcc] sm:$0xf0] }
  0x50   : > { %1083 = vmatpush.bf16.msra.mxu2 %v2375_v17  ;;  %v2399_v17 = vor.u32 %v2912_v14, %v2396_v15  ;;  %v2948_v14 = vld [vmem:[%s4198_s5 + $0xc4] sm:$0xf]  ;;  %v2540_v15 = vld [vmem:[%s4198_s5 + $0xd0] sm:$0xf0] }
  0x51   : > { %1097 = vmatpush.bf16.msra.mxu3 %v2439_v21  ;;  %v2191_v21 = vor.u32 %v2860_v16, %v2188_v18  ;;  %v2506_v18 = vld [vmem:[%s4198_s5 + $0x80] sm:$0xf]  ;;  %v2543_v20 = vor.u32 %v2948_v14, %v2540_v15  ;;  %v2953_v14 = vld [vmem:[%s4198_s5 + $0xec] sm:$0xf]  ;;  %v2564_v15 = vld [vmem:[%s4198_s5 + $0xf8] sm:$0xf0] }
  0x52   : > { %1056 = vmatpush.bf16.msra.mxu0 %v2239_v5  ;;  %v2862_v5 = vld [vmem:[%s4196_s3 + $0x14] sm:$0xf]  ;;  %v2507_v23 = vor.u32 %v2942_v19, %v2506_v18  ;;  %v2618_v18 = vld [vmem:[%s4198_s5 + $0x160] sm:$0xf]  ;;  %v2970_v19 = vld [vmem:[%s4198_s5 + $0x16c] sm:$0xf0] }
  0x53   : > { %1070 = vmatpush.bf16.msra.mxu1 %v2303_v9  ;;  %v2199_v8 = vor.u32 %v2862_v5, %v2196_v6  ;;  %v2260_v9 = vld [vmem:[%s4196_s3 + $0x98] sm:$0xf0]  ;;  %v2522_v6 = vld [vmem:[%s4198_s5 + $0xa0] sm:$0xf] }
  0x54   : > { %1084 = vmatpush.bf16.msra.mxu2 %v2367_v29  ;;  %v2263_v12 = vor.u32 %v2878_v7, %v2260_v9  ;;  %v371_v29 = vld [vmem:[%s4195_s2] sm:$0xf]  ;;  %v2946_v7 = vld [vmem:[%s4198_s5 + $0xac] sm:$0xf0] }
  0x55   : > { %1098 = vmatpush.bf16.msra.mxu3 %v2431_v32  ;;  %v2316_v32 = vld [vmem:[%s4196_s3 + $0x108] sm:$0xf0]  ;;  %v373_v34 = vperm.slane %v371_v29, 0  ;;  %v375_v51 = vperm.slane %v371_v29, 2  ;;  %v376_v53 = vperm.slane %v371_v29, 3  ;;  %v2523_v16 = vor.u32 %v2946_v7, %v2522_v6 }
  0x56   : > { %1057 = vmatpush.bf16.msra.mxu0 %v2231_v25  ;;  %v2910_v25 = vld [vmem:[%s4196_s3 + $0x194] sm:$0xf] }
  0x57   : > { %1071 = vmatpush.bf16.msra.mxu1 %v2295_v26  ;;  %v2388_v26 = vld [vmem:[%s4196_s3 + $0x198] sm:$0xf0]  ;;  %v2444_v6 = vld [vmem:[%s4198_s5 + $0x10] sm:$0xf0] }
  0x58   : > { %1085 = vmatpush.bf16.msra.mxu2 %v2359_v42  ;;  %v2391_v28 = vor.u32 %v2910_v25, %v2388_v26  ;;  %v2940_v25 = vld [vmem:[%s4198_s5 + $0x84] sm:$0xf]  ;;  %v2508_v26 = vld [vmem:[%s4198_s5 + $0x90] sm:$0xf0] }
  0x59   : > { %1099 = vmatpush.bf16.msra.mxu3 %v2423_v44 }
  0x5a   : > { %1058 = vmatpush.bf16.msra.mxu0 %v2223_v36  ;;  %v2319_v36 = vor.u32 %v2892_v31, %v2316_v32  ;;  %v2986_v32 = vld [vmem:[%s4198_s5 + $0x1ec] sm:$0xf0] }
  0x5b   : > { %1072 = vmatpush.bf16.msra.mxu1 %v2287_v38  ;;  %v374_v38 = vperm.slane %v371_v29, 1  ;;  %v2938_v29 = vld [vmem:[%s4198_s5 + $0x6c] sm:$0xf0] }
  0x5c   : > { %1086 = vmatpush.bf16.msra.mxu2 %v2351_v54 }
  0x5d   : > { %1100 = vmatpush.bf16.msra.mxu3 %v2415_v56 }
  0x5e   : > { %1059 = vmatpush.bf16.msra.mxu0 %v2215_v48  ;;  %v2554_v48 = vld [vmem:[%s4198_s5 + $0xe0] sm:$0xf] }
  0x5f   : > { %1073 = vmatpush.bf16.msra.mxu1 %v2279_v50  ;;  %v2555_v56 = vor.u32 %v2954_v49, %v2554_v48  ;;  %v2980_v49 = vld [vmem:[%s4198_s5 + $0x1c4] sm:$0xf] }
  0x60   : > { %1087 = vmatpush.bf16.msra.mxu2 %v2343_v2  ;;  %v2952_v2 = vld [vmem:[%s4198_s5 + $0xe4] sm:$0xf] }
  0x61   : > { %1101 = vmatpush.bf16.msra.mxu3 %v2407_v4  ;;  %v2539_v4 = vor.u32 %v2950_v59, %v2538_v58  ;;  %v2460_v58 = vld [vmem:[%s4198_s5 + $0x30] sm:$0xf0] }
  0x62   : > { %1060 = vmatpush.bf16.msra.mxu0 %v2207_v60 }
  0x63   : > { %1074 = vmatpush.bf16.msra.mxu1 %v2271_v62 }
  0x64   : > { %1088 = vmatpush.bf16.msra.mxu2 %v2335_v13 }
  0x65   : > { %1102 = vmatpush.bf16.msra.mxu3 %v2399_v17 }
  0x66   : > { %1061 = vmatpush.bf16.msra.mxu0 %v2199_v8 }
  0x67   : > { %1075 = vmatpush.bf16.msra.mxu1 %v2263_v12  ;;  %v2559_v12 = vor.u32 %v2952_v2, %v2556_v3  ;;  %v2634_v2 = vld [vmem:[%s4198_s5 + $0x180] sm:$0xf] }
  0x68   : > { %1089 = vmatpush.bf16.msra.mxu2 %v2327_v27  ;;  %v2511_v27 = vor.u32 %v2940_v25, %v2508_v26  ;;  %v2951_v25 = vld [vmem:[%s4198_s5 + $0xd4] sm:$0xf0]  ;;  %v2949_v26 = vld [vmem:[%s4198_s5 + $0xcc] sm:$0xf] }
  0x69   : > { %1103 = vmatpush.bf16.msra.mxu3 %v2391_v28  ;;  %v2490_v28 = vld [vmem:[%s4198_s5 + $0x60] sm:$0xf] }
  0x6a   : > { %1062 = vmatpush.bf16.msra.mxu0 %v2191_v21  ;;  %v2944_v21 = vld [vmem:[%s4198_s5 + $0xa4] sm:$0xf]  ;;  %v2491_v31 = vor.u32 %v2938_v29, %v2490_v28 }
  0x6b   : > { %1076 = vmatpush.bf16.msra.mxu1 %v2255_v22  ;;  %v2524_v22 = vld [vmem:[%s4198_s5 + $0xb0] sm:$0xf0] }
  0x6c   : > { %1090 = vmatpush.bf16.msra.mxu2 %v2319_v36  ;;  %v2527_v24 = vor.u32 %v2944_v21, %v2524_v22  ;;  %v2619_v21 = vor.u32 %v2970_v19, %v2618_v18  ;;  %v2620_v22 = vld [vmem:[%s4198_s5 + $0x170] sm:$0xf0]  ;;  %v2981_v18 = vld [vmem:[%s4198_s5 + $0x1cc] sm:$0xf]  ;;  %v2676_v19 = vld [vmem:[%s4198_s5 + $0x1d8] sm:$0xf0] }
  0x6d   : > { %1104 = vmatpush.bf16.msra.mxu3 %v2383_v39 }
  0xaa   : > { %v550_v30 = vpop.f32.mrf.mxu0 }
  0xab   : > { %v564_v35 = vpop.f32.mrf.mxu1  ;;  %v551_v40 = vadd.f32 %v550_v30, %v373_v34  ;;  %v2682_v30 = vld [vmem:[%s4198_s5 + $0x1e0] sm:$0xf] }
  0xac   : > { %v565_v41 = vadd.f32 %v564_v35, %v374_v38  ;;  %v2683_v35 = vor.u32 %v2986_v32, %v2682_v30  ;;  %v2602_v30 = vld [vmem:[%s4198_s5 + $0x140] sm:$0xf]  ;;  %v2964_v32 = vld [vmem:[%s4198_s5 + $0x144] sm:$0xf] }
  0xad   : > { %v597_v45 = vmax.f32 %v551_v40, 0.0  ;;  %v2474_v40 = vld [vmem:[%s4198_s5 + $0x40] sm:$0xf] }
  0xae   : > { %v598_v50 = vmax.f32 %v565_v41, 0.0  ;;  %v2934_v41 = vld [vmem:[%s4198_s5 + $0x4c] sm:$0xf0] }
  0xb2   : > { %v578_v42 = vpop.f32.mrf.mxu2  ;;  %v552_v44 = vpop.f32.mrf.mxu0 }
  0xb3   : > { %v592_v43 = vpop.f32.mrf.mxu3  ;;  %v553_v46 = vadd.f32 %v552_v44, %v373_v34  ;;  %v566_v47 = vpop.f32.mrf.mxu1  ;;  %v579_v60 = vadd.f32 %v578_v42, %v375_v51  ;;  %v2492_v34 = vld [vmem:[%s4198_s5 + $0x70] sm:$0xf0]  ;;  %v2666_v42 = vld [vmem:[%s4198_s5 + $0x1c0] sm:$0xf]  ;;  %v2982_v44 = vld [vmem:[%s4198_s5 + $0x1cc] sm:$0xf0] }
  0xb4   : > { %v567_v52 = vadd.f32 %v566_v47, %v374_v38  ;;  %v593_v62 = vadd.f32 %v592_v43, %v376_v53  ;;  %v2495_v36 = vor.u32 %v2936_v33, %v2492_v34  ;;  %v2684_v38 = vld [vmem:[%s4198_s5 + $0x1f0] sm:$0xf0]  ;;  %v2475_v43 = vor.u32 %v2934_v41, %v2474_v40  ;;  %v2532_v40 = vld [vmem:[%s4198_s5 + $0xb8] sm:$0xf0] }
  0xb5   : > { %v601_v54 = vmax.f32 %v553_v46, 0.0  ;;  %v599_v8 = vmax.f32 %v579_v60, 0.0  ;;  %v2687_v39 = vor.u32 %v2984_v37, %v2684_v38  ;;  %v2476_v46 = vld [vmem:[%s4198_s5 + $0x50] sm:$0xf0]  ;;  %v2667_v47 = vor.u32 %v2982_v44, %v2666_v42  ;;  %v2586_v42 = vld [vmem:[%s4198_s5 + $0x120] sm:$0xf] }
  0xb6   : > { %v602_v55 = vmax.f32 %v567_v52, 0.0  ;;  %v600_v10 = vmax.f32 %v593_v62, 0.0  ;;  %v2458_v52 = vld [vmem:[%s4198_s5 + $0x20] sm:$0xf]  ;;  %v2652_v62 = vld [vmem:[%s4198_s5 + $0x1b0] sm:$0xf0] }
  0xb7   : > { %v605_v57 = vpack.c.bf16 %v601_v54, %v597_v45  ;;  %v2932_v45 = vld [vmem:[%s4198_s5 + $0x44] sm:$0xf]  ;;  %v2650_v54 = vld [vmem:[%s4198_s5 + $0x1a0] sm:$0xf]  ;;  %v2604_v34 = vld [vmem:[%s4198_s5 + $0x150] sm:$0xf0] }
  0xb8   : > { %v606_v61 = vpack.c.bf16 %v602_v55, %v598_v50  ;;  %v2479_v48 = vor.u32 %v2932_v45, %v2476_v46  ;;  %v2668_v50 = vld [vmem:[%s4198_s5 + $0x1d0] sm:$0xf0]  ;;  %v2607_v37 = vor.u32 %v2964_v32, %v2604_v34  ;;  %v2960_v44 = vld [vmem:[%s4198_s5 + $0x124] sm:$0xf]  ;;  %v2977_v32 = vld [vmem:[%s4198_s5 + $0x1ac] sm:$0xf] }
  0xb9   : > { %1007 = vmatmul.bf16.vlgmr.msrb.gmra.mxu0 %v605_v57  ;;  %v2588_v46 = vld [vmem:[%s4198_s5 + $0x130] sm:$0xf0] }
  0xba   : > { %v580_v63 = vpop.f32.mrf.mxu2  ;;  %1021 = vmatmul.bf16.vlgmr.msrb.gmra.mxu1 %v606_v61  ;;  %1511 = vmatpush.bf16.msrb.mxu0 %v2555_v56  ;;  %v2978_v56 = vld [vmem:[%s4198_s5 + $0x1ac] sm:$0xf0] }
  0xbb   : > { %v581_v0 = vadd.f32 %v580_v63, %v375_v51  ;;  %v594_v1 = vpop.f32.mrf.mxu3  ;;  %1525 = vmatpush.bf16.msrb.mxu1 %v2683_v35  ;;  %v2671_v51 = vor.u32 %v2980_v49, %v2668_v50  ;;  %v2651_v59 = vor.u32 %v2978_v56, %v2650_v54  ;;  %v2530_v35 = vld [vmem:[%s4198_s5 + $0xa8] sm:$0xf]  ;;  %v2591_v49 = vor.u32 %v2960_v44, %v2588_v46  ;;  %v2570_v54 = vld [vmem:[%s4198_s5 + $0x100] sm:$0xf]  ;;  %v2956_v56 = vld [vmem:[%s4198_s5 + $0x104] sm:$0xf] }
  0xbc   : > { %v595_v5 = vadd.f32 %v594_v1, %v376_v53  ;;  %v2930_v53 = vld [vmem:[%s4198_s5 + $0x2c] sm:$0xf0]  ;;  %v2973_v46 = vld [vmem:[%s4198_s5 + $0x18c] sm:$0xf] }
  0xbd   : > { %v603_v9 = vmax.f32 %v581_v0, 0.0  ;;  %v2459_v55 = vor.u32 %v2930_v53, %v2458_v52  ;;  %v2442_v0 = vld [vmem:[%s4198_s5] sm:$0xf]  ;;  %v2926_v1 = vld [vmem:[%s4198_s5 + $0xc] sm:$0xf0] }
  0xbe   : > { %v604_v11 = vmax.f32 %v595_v5, 0.0  ;;  %1512 = vmatpush.bf16.msrb.mxu0 %v2539_v4  ;;  %v2443_v3 = vor.u32 %v2926_v1, %v2442_v0  ;;  %v2974_v4 = vld [vmem:[%s4198_s5 + $0x18c] sm:$0xf0]  ;;  %v2924_v5 = vld [vmem:[%s4198_s5 + $0x4] sm:$0xf] }
  0xbf   : > { %v607_v13 = vpack.c.bf16 %v603_v9, %v599_v8  ;;  %1526 = vmatpush.bf16.msrb.mxu1 %v2667_v47  ;;  %v2635_v7 = vor.u32 %v2974_v4, %v2634_v2  ;;  %v2447_v8 = vor.u32 %v2924_v5, %v2444_v6  ;;  %v2972_v9 = vld [vmem:[%s4198_s5 + $0x184] sm:$0xf]  ;;  %v2514_v47 = vld [vmem:[%s4198_s5 + $0x88] sm:$0xf]  ;;  %v2516_v52 = vld [vmem:[%s4198_s5 + $0x98] sm:$0xf0] }
  0xc0   : > { %v608_v17 = vpack.c.bf16 %v604_v11, %v600_v10  ;;  %v2636_v10 = vld [vmem:[%s4198_s5 + $0x190] sm:$0xf0]  ;;  %v2562_v11 = vld [vmem:[%s4198_s5 + $0xe8] sm:$0xf]  ;;  %v2987_v0 = vld [vmem:[%s4198_s5 + $0x1f4] sm:$0xf0] }
  0xc1   : > { %1035 = vmatmul.bf16.vlgmr.msrb.gmra.mxu2 %v607_v13  ;;  %v2937_v1 = vld [vmem:[%s4198_s5 + $0x6c] sm:$0xf]  ;;  %v2692_v5 = vld [vmem:[%s4198_s5 + $0x1f8] sm:$0xf0] }
  0xc2   : > { %1049 = vmatmul.bf16.vlgmr.msrb.gmra.mxu3 %v608_v17  ;;  %1539 = vmatpush.bf16.msrb.mxu2 %v2559_v12  ;;  %v2639_v12 = vor.u32 %v2972_v9, %v2636_v10  ;;  %v2985_v4 = vld [vmem:[%s4198_s5 + $0x1ec] sm:$0xf]  ;;  %v2482_v9 = vld [vmem:[%s4198_s5 + $0x48] sm:$0xf]  ;;  %v2935_v10 = vld [vmem:[%s4198_s5 + $0x54] sm:$0xf0] }
  0xc3   : > { %1513 = vmatpush.bf16.msrb.mxu0 %v2523_v16  ;;  %1553 = vmatpush.bf16.msrb.mxu3 %v2687_v39  ;;  %v2945_v39 = vld [vmem:[%s4198_s5 + $0xac] sm:$0xf] }
  0xc4   : > { %1527 = vmatpush.bf16.msrb.mxu1 %v2651_v59  ;;  %v2535_v41 = vor.u32 %v2945_v39, %v2532_v40  ;;  %v2498_v59 = vld [vmem:[%s4198_s5 + $0x68] sm:$0xf] }
  0xc5   : > { %v2642_v39 = vld [vmem:[%s4198_s5 + $0x188] sm:$0xf] }
  0xc6   : > { %1540 = vmatpush.bf16.msrb.mxu2 %v2543_v20  ;;  %v2968_v20 = vld [vmem:[%s4198_s5 + $0x164] sm:$0xf] }
  0xc7   : > { %1514 = vmatpush.bf16.msrb.mxu0 %v2507_v23  ;;  %1554 = vmatpush.bf16.msrb.mxu3 %v2671_v51  ;;  %v2546_v23 = vld [vmem:[%s4198_s5 + $0xc8] sm:$0xf]  ;;  %v2941_v51 = vld [vmem:[%s4198_s5 + $0x8c] sm:$0xf] }
  0xc8   : > { %1528 = vmatpush.bf16.msrb.mxu1 %v2635_v7  ;;  %v2547_v28 = vor.u32 %v2951_v25, %v2546_v23  ;;  %v2519_v53 = vor.u32 %v2941_v51, %v2516_v52  ;;  %v2466_v23 = vld [vmem:[%s4198_s5 + $0x28] sm:$0xf]  ;;  %v2971_v52 = vld [vmem:[%s4198_s5 + $0x174] sm:$0xf0] }
  0xc9   : > { %1063 = vmatmul.bf16.vlgmr.msra.gmra.mxu0 %v605_v57  ;;  %v2928_v57 = vld [vmem:[%s4198_s5 + $0x24] sm:$0xf]  ;;  %v2658_v25 = vld [vmem:[%s4198_s5 + $0x1a8] sm:$0xf] }
  0xca   : > { %1541 = vmatpush.bf16.msrb.mxu2 %v2527_v24  ;;  %1077 = vmatmul.bf16.vlgmr.msra.gmra.mxu1 %v606_v61  ;;  %v2463_v60 = vor.u32 %v2928_v57, %v2460_v58  ;;  %v2976_v61 = vld [vmem:[%s4198_s5 + $0x1a4] sm:$0xf]  ;;  %v2623_v24 = vor.u32 %v2968_v20, %v2620_v22  ;;  %v2572_v58 = vld [vmem:[%s4198_s5 + $0x110] sm:$0xf0]  ;;  %v3983_v20 = vld [vmem:[%s4197_s4] sm:$0x3] }
  0xcb   : > { %1515 = vmatpush.bf16.msrb.mxu0 %v2491_v31  ;;  %v2655_v63 = vor.u32 %v2976_v61, %v2652_v62  ;;  %v2966_v31 = vld [vmem:[%s4198_s5 + $0x14c] sm:$0xf0]  ;;  %v2575_v61 = vor.u32 %v2956_v56, %v2572_v58  ;;  %v675_v34 = vperm.slane %v3983_v20, 0  ;;  %v2626_v51 = vld [vmem:[%s4198_s5 + $0x168] sm:$0xf] }
  0xcc   : > { %1529 = vmatpush.bf16.msrb.mxu1 %v2619_v21  ;;  %v2603_v33 = vor.u32 %v2966_v31, %v2602_v30  ;;  %v2679_v21 = vor.u32 %v2981_v18, %v2676_v19  ;;  %v2628_v56 = vld [vmem:[%s4198_s5 + $0x178] sm:$0xf0]  ;;  %v676_v18 = vperm.slane %v3983_v20, 1 }
  0xcd   : > { %1555 = vmatpush.bf16.msrb.mxu3 %v2655_v63  ;;  %v2690_v63 = vld [vmem:[%s4198_s5 + $0x1e8] sm:$0xf] }
  0xce   : > { %1542 = vmatpush.bf16.msrb.mxu2 %v2511_v27  ;;  %v2548_v27 = vld [vmem:[%s4198_s5 + $0xd8] sm:$0xf0]  ;;  %v2691_v2 = vor.u32 %v2987_v0, %v2690_v63  ;;  %v2965_v63 = vld [vmem:[%s4198_s5 + $0x14c] sm:$0xf] }
  0xcf   : > { %1516 = vmatpush.bf16.msrb.mxu0 %v2475_v43  ;;  %v2551_v29 = vor.u32 %v2949_v26, %v2548_v27  ;;  %v2962_v43 = vld [vmem:[%s4198_s5 + $0x12c] sm:$0xf0]  ;;  %v2979_v27 = vld [vmem:[%s4198_s5 + $0x1b4] sm:$0xf0]  ;;  %v2612_v0 = vld [vmem:[%s4198_s5 + $0x158] sm:$0xf0] }
  0xd0   : > { %1530 = vmatpush.bf16.msrb.mxu1 %v2603_v33  ;;  %v2587_v45 = vor.u32 %v2962_v43, %v2586_v42  ;;  %v2659_v30 = vor.u32 %v2979_v27, %v2658_v25  ;;  %v2660_v33 = vld [vmem:[%s4198_s5 + $0x1b8] sm:$0xf0]  ;;  %v2925_v42 = vld [vmem:[%s4198_s5 + $0xc] sm:$0xf] }
  0xd1   : > { %1091 = vmatmul.bf16.vlgmr.msra.gmra.mxu2 %v607_v13  ;;  %v2955_v13 = vld [vmem:[%s4198_s5 + $0xf4] sm:$0xf0]  ;;  %1556 = vmatpush.bf16.msrb.mxu3 %v2639_v12  ;;  %v2483_v12 = vor.u32 %v2935_v10, %v2482_v9  ;;  %v2452_v43 = vld [vmem:[%s4198_s5 + $0x18] sm:$0xf0] }
  0xd2   : > { %1105 = vmatmul.bf16.vlgmr.msra.gmra.mxu3 %v608_v17  ;;  %1543 = vmatpush.bf16.msrb.mxu2 %v2495_v36  ;;  %v2563_v16 = vor.u32 %v2955_v13, %v2562_v11  ;;  %v2567_v17 = vor.u32 %v2953_v14, %v2564_v15  ;;  %v2947_v36 = vld [vmem:[%s4198_s5 + $0xb4] sm:$0xf0]  ;;  %v2674_v11 = vld [vmem:[%s4198_s5 + $0x1c8] sm:$0xf]  ;;  %v2933_v14 = vld [vmem:[%s4198_s5 + $0x4c] sm:$0xf] }
  0xd3   : > { %1517 = vmatpush.bf16.msrb.mxu0 %v2459_v55  ;;  %v2531_v38 = vor.u32 %v2947_v36, %v2530_v35  ;;  %v2958_v55 = vld [vmem:[%s4198_s5 + $0x10c] sm:$0xf0]  ;;  %v2983_v13 = vld [vmem:[%s4198_s5 + $0x1d4] sm:$0xf0]  ;;  %v2484_v15 = vld [vmem:[%s4198_s5 + $0x58] sm:$0xf0]  ;;  %v2663_v35 = vor.u32 %v2977_v32, %v2660_v33 }
  0xd4   : > { %1531 = vmatpush.bf16.msrb.mxu1 %v2587_v45  ;;  %v2571_v57 = vor.u32 %v2958_v55, %v2570_v54  ;;  %v2455_v45 = vor.u32 %v2925_v42, %v2452_v43  ;;  %v2627_v55 = vor.u32 %v2971_v52, %v2626_v51  ;;  %v2596_v9 = vld [vmem:[%s4198_s5 + $0x138] sm:$0xf0]  ;;  %v3001_v51 = vld [vmem:[%s4200_s7 + $0x68] sm:$0xff] }
  0xd5   : > { %1557 = vmatpush.bf16.msrb.mxu3 %v2623_v24  ;;  %v2931_v24 = vld [vmem:[%s4198_s5 + $0x34] sm:$0xf0] }
  0xd6   : > { %1544 = vmatpush.bf16.msrb.mxu2 %v2479_v48  ;;  %v2943_v48 = vld [vmem:[%s4198_s5 + $0x94] sm:$0xf0]  ;;  %v2467_v26 = vor.u32 %v2931_v24, %v2466_v23 }
  0xd7   : > { %1518 = vmatpush.bf16.msrb.mxu0 %v2443_v3  ;;  %v2515_v50 = vor.u32 %v2943_v48, %v2514_v47  ;;  %v2500_v3 = vld [vmem:[%s4198_s5 + $0x78] sm:$0xf0] }
  0xd8   : > { %1532 = vmatpush.bf16.msrb.mxu1 %v2571_v57  ;;  %v2503_v7 = vor.u32 %v2937_v1, %v2500_v3  ;;  %v2644_v47 = vld [vmem:[%s4198_s5 + $0x198] sm:$0xf0]  ;;  %v2594_v3 = vld [vmem:[%s4198_s5 + $0x128] sm:$0xf] }
  0xd9   : > { %1558 = vmatpush.bf16.msrb.mxu3 %v2607_v37  ;;  %v2450_v37 = vld [vmem:[%s4198_s5 + $0x8] sm:$0xf]  ;;  %v2991_v52 = vld [vmem:[%s4200_s7 + $0x18] sm:$0xff] }
  0xda   : > { %1545 = vmatpush.bf16.msrb.mxu2 %v2463_v60  ;;  %v2939_v60 = vld [vmem:[%s4198_s5 + $0x74] sm:$0xf0] }
  0xdb   : > { %1567 = vmatpush.bf16.msra.mxu0 %v2563_v16  ;;  %v2499_v62 = vor.u32 %v2939_v60, %v2498_v59  ;;  %v2675_v16 = vor.u32 %v2983_v13, %v2674_v11  ;;  %v2610_v59 = vld [vmem:[%s4198_s5 + $0x148] sm:$0xf]  ;;  %v2967_v60 = vld [vmem:[%s4198_s5 + $0x154] sm:$0xf0] }
  0xdc   : > { %1581 = vmatpush.bf16.msra.mxu1 %v2691_v2  ;;  %v2611_v1 = vor.u32 %v2967_v60, %v2610_v59  ;;  %v2989_v59 = vld [vmem:[%s4200_s7 + $0x8] sm:$0xff] }
  0xdd   : > { %1559 = vmatpush.bf16.msrb.mxu3 %v2591_v49  ;;  %v2647_v49 = vor.u32 %v2973_v46, %v2644_v47  ;;  %v2994_v46 = vld [vmem:[%s4200_s7 + $0x30] sm:$0xff]  ;;  %v3003_v47 = vld [vmem:[%s4200_s7 + $0x78] sm:$0xff]  ;;  %v3009_v60 = vld [vmem:[%s4200_s7 + $0xa8] sm:$0xff] }
  0xde   : > { %1546 = vmatpush.bf16.msrb.mxu2 %v2447_v8  ;;  %v2695_v8 = vor.u32 %v2985_v4, %v2692_v5  ;;  %v2963_v4 = vld [vmem:[%s4198_s5 + $0x134] sm:$0xf0] }
  0xdf   : > { %1568 = vmatpush.bf16.msra.mxu0 %v2547_v28  ;;  %v2929_v28 = vld [vmem:[%s4198_s5 + $0x2c] sm:$0xf]  ;;  %v2595_v11 = vor.u32 %v2963_v4, %v2594_v3  ;;  %v3007_v3 = vld [vmem:[%s4200_s7 + $0x98] sm:$0xff]  ;;  %v2996_v4 = vld [vmem:[%s4200_s7 + $0x40] sm:$0xff] }
  0xe0   : > { %1582 = vmatpush.bf16.msra.mxu1 %v2675_v16  ;;  %v2959_v16 = vld [vmem:[%s4198_s5 + $0x114] sm:$0xf0] }
  0xe1   : > { %1560 = vmatpush.bf16.msrb.mxu3 %v2575_v61 }
  0xe2   : > { %1595 = vmatpush.bf16.msra.mxu2 %v2567_v17  ;;  %v2487_v17 = vor.u32 %v2933_v14, %v2484_v15  ;;  %v2578_v15 = vld [vmem:[%s4198_s5 + $0x108] sm:$0xf] }
  0xe3   : > { %1569 = vmatpush.bf16.msra.mxu0 %v2531_v38  ;;  %v2927_v38 = vld [vmem:[%s4198_s5 + $0x14] sm:$0xf0]  ;;  %v2579_v24 = vor.u32 %v2959_v16, %v2578_v15 }
  0xe4   : > { %1583 = vmatpush.bf16.msra.mxu1 %v2659_v30  ;;  %v2451_v40 = vor.u32 %v2927_v38, %v2450_v37 }
  0xe5   : > { %1609 = vmatpush.bf16.msra.mxu3 %v2695_v8  ;;  %v2961_v8 = vld [vmem:[%s4198_s5 + $0x12c] sm:$0xf] }
  0xe6   : > { %1596 = vmatpush.bf16.msra.mxu2 %v2551_v29  ;;  %v2468_v29 = vld [vmem:[%s4198_s5 + $0x38] sm:$0xf0] }
  0xe7   : > { %1570 = vmatpush.bf16.msra.mxu0 %v2515_v50  ;;  %v2471_v31 = vor.u32 %v2929_v28, %v2468_v29 }
  0xe9   : > { %1610 = vmatpush.bf16.msra.mxu3 %v2679_v21  ;;  %v2957_v21 = vld [vmem:[%s4198_s5 + $0x10c] sm:$0xf] }
  0xea   : > { %1597 = vmatpush.bf16.msra.mxu2 %v2535_v41  ;;  %v2975_v41 = vld [vmem:[%s4198_s5 + $0x194] sm:$0xf0] }
  0xeb   : > { %1571 = vmatpush.bf16.msra.mxu0 %v2499_v62  ;;  %v2643_v44 = vor.u32 %v2975_v41, %v2642_v39 }
  0xed   : > { %1611 = vmatpush.bf16.msra.mxu3 %v2663_v35  ;;  %1584 = vmatpush.bf16.msra.mxu1 %v2643_v44 }
  0xee   : > { %1598 = vmatpush.bf16.msra.mxu2 %v2519_v53  ;;  %v2969_v53 = vld [vmem:[%s4198_s5 + $0x16c] sm:$0xf] }
  0xef   : > { %1572 = vmatpush.bf16.msra.mxu0 %v2483_v12  ;;  %v2631_v58 = vor.u32 %v2969_v53, %v2628_v56  ;;  %v3011_v53 = vld [vmem:[%s4200_s7 + $0xb8] sm:$0xff]  ;;  %v3010_v56 = vld [vmem:[%s4200_s7 + $0xb0] sm:$0xff] }
  0xf1   : > { %1612 = vmatpush.bf16.msra.mxu3 %v2647_v49  ;;  %1585 = vmatpush.bf16.msra.mxu1 %v2627_v55  ;;  %v3002_v49 = vld [vmem:[%s4200_s7 + $0x70] sm:$0xff] }
  0xf2   : > { %1599 = vmatpush.bf16.msra.mxu2 %v2503_v7  ;;  %v2990_v55 = vld [vmem:[%s4200_s7 + $0x10] sm:$0xff] }
  0xf3   : > { %1573 = vmatpush.bf16.msra.mxu0 %v2467_v26 }
  0xf5   : > { %1613 = vmatpush.bf16.msra.mxu3 %v2631_v58  ;;  %1586 = vmatpush.bf16.msra.mxu1 %v2611_v1  ;;  %v3019_v58 = vld [vmem:[%s4200_s7 + $0xf8] sm:$0xff]  ;;  %v2997_v1 = vld [vmem:[%s4200_s7 + $0x48] sm:$0xff] }
  0xf6   : > { %1600 = vmatpush.bf16.msra.mxu2 %v2487_v17  ;;  %v2599_v17 = vor.u32 %v2961_v8, %v2596_v9  ;;  %v3005_v9 = vld [vmem:[%s4200_s7 + $0x88] sm:$0xff] }
  0xf7   : > { %1574 = vmatpush.bf16.msra.mxu0 %v2451_v40 }
  0xf9   : > { %1587 = vmatpush.bf16.msra.mxu1 %v2595_v11  ;;  %v3004_v11 = vld [vmem:[%s4200_s7 + $0x80] sm:$0xff] }
  0xfa   : > { %1601 = vmatpush.bf16.msra.mxu2 %v2471_v31 }
  0xfd   : > { %1588 = vmatpush.bf16.msra.mxu1 %v2579_v24 }
  0xfe   : > { %1602 = vmatpush.bf16.msra.mxu2 %v2455_v45  ;;  %v2995_v45 = vld [vmem:[%s4200_s7 + $0x38] sm:$0xff] }
 0x136   : > { %v1008_v6 = vpop.f32.mrf.mxu0 }
 0x137   : > { %v1022_v22 = vpop.f32.mrf.mxu1  ;;  %v1009_v48 = vadd.f32 %v1008_v6, %v675_v34  ;;  %v2615_v6 = vor.u32 %v2965_v63, %v2612_v0  ;;  %v2988_v63 = vld [vmem:[%s4200_s7] sm:$0xff] }
 0x138   : > { %v3008_v0 = vld [vmem:[%s4200_s7 + $0xa0] sm:$0xff] }
 0x139   : > { %v1023_v61 = vadd.f32 %v1022_v22, %v1009_v48  ;;  %1614 = vmatpush.bf16.msra.mxu3 %v2615_v6  ;;  %v2580_v22 = vld [vmem:[%s4198_s5 + $0x118] sm:$0xf0]  ;;  %v2993_v48 = vld [vmem:[%s4200_s7 + $0x28] sm:$0xff]  ;;  %v3006_v6 = vld [vmem:[%s4200_s7 + $0x90] sm:$0xff] }
 0x13a   : > { %v2583_v27 = vor.u32 %v2957_v21, %v2580_v22 }
 0x13d   : > { %1615 = vmatpush.bf16.msra.mxu3 %v2599_v17 }
 0x13e   : > { %v1010_v36 = vpop.f32.mrf.mxu0 }
 0x13f   : > { %v1024_v57 = vpop.f32.mrf.mxu1  ;;  %v1011_v62 = vadd.f32 %v1010_v36, %v675_v34 }
 0x141   : > { %v1025_v7 = vadd.f32 %v1024_v57, %v1011_v62  ;;  %1616 = vmatpush.bf16.msra.mxu3 %v2583_v27  ;;  %v2999_v57 = vld [vmem:[%s4200_s7 + $0x58] sm:$0xff]  ;;  %v3018_v62 = vld [vmem:[%s4200_s7 + $0xf0] sm:$0xff] }
 0x144   : > { %v1036_v50 = vpop.f32.mrf.mxu2 }
 0x145   : > { %v1050_v54 = vpop.f32.mrf.mxu3  ;;  %v1037_v2 = vadd.f32 %v1036_v50, %v1023_v61  ;;  %v2992_v50 = vld [vmem:[%s4200_s7 + $0x20] sm:$0xff]  ;;  %v2998_v61 = vld [vmem:[%s4200_s7 + $0x50] sm:$0xff] }
 0x146   : > { %v1064_v5 = vpop.f32.mrf.mxu0 }
 0x147   : > { %v1051_v12 = vadd.f32 %v1050_v54, %v1037_v2  ;;  %v1078_v23 = vpop.f32.mrf.mxu1  ;;  %v1065_v28 = vadd.f32 %v1064_v5, %v676_v18  ;;  %v3000_v54 = vld [vmem:[%s4200_s7 + $0x60] sm:$0xff]  ;;  %v3017_v2 = vld [vmem:[%s4200_s7 + $0xe8] sm:$0xff] }
 0x148   : > { %v3016_v5 = vld [vmem:[%s4200_s7 + $0xe0] sm:$0xff] }
 0x149   : > { %v1111_v25 = vmax.f32 %v1051_v12, 0.0  ;;  %v1079_v32 = vadd.f32 %v1078_v23, %v1065_v28 }
 0x14c   : > { %v1038_v10 = vpop.f32.mrf.mxu2 }
 0x14d   : > { %v1039_v13 = vadd.f32 %v1038_v10, %v1025_v7  ;;  %v1052_v14 = vpop.f32.mrf.mxu3  ;;  %v3015_v7 = vld [vmem:[%s4200_s7 + $0xd8] sm:$0xff]  ;;  %v3014_v10 = vld [vmem:[%s4200_s7 + $0xd0] sm:$0xff] }
 0x14e   : > { %v1066_v30 = vpop.f32.mrf.mxu0 }
 0x14f   : > { %v1053_v19 = vadd.f32 %v1052_v14, %v1039_v13  ;;  %v1067_v33 = vadd.f32 %v1066_v30, %v676_v18  ;;  %v1080_v35 = vpop.f32.mrf.mxu1  ;;  %v3013_v13 = vld [vmem:[%s4200_s7 + $0xc8] sm:$0xff]  ;;  %v1181_v14 = vld [vmem:[%s4199_s6] sm:$0xf] }
 0x150   : > { %v1183_v17 = vperm.slane %v1181_v14, 0  ;;  %v3012_v18 = vld [vmem:[%s4200_s7 + $0xc0] sm:$0xff]  ;;  %v1184_v23 = vperm.slane %v1181_v14, 1 }
 0x151   : > { %v1113_v26 = vmax.f32 %v1053_v19, 0.0  ;;  %v1081_v36 = vadd.f32 %v1080_v35, %v1067_v33 }
 0x153   : > { %v1115_v29 = vpack.c.bf16 %v1113_v26, %v1111_v25 }
 0x154   : > { %v1092_v20 = vpop.f32.mrf.mxu2 }
 0x155   : > { %v1106_v31 = vpop.f32.mrf.mxu3  ;;  %1519 = vmatmul.bf16.vlgmr.msrb.gmra.mxu0 %v1115_v29  ;;  %1547 = vmatmul.bf16.vlgmr.msrb.gmra.mxu2 %v1115_v29  ;;  %v1093_v34 = vadd.f32 %v1092_v20, %v1079_v32 }
 0x156   : > { %1895 = vmatpush.bf16.msrb.mxu0 %v2995_v45  ;;  %1923 = vmatpush.bf16.msrb.mxu2 %v3011_v53  ;;  %v1186_v45 = vperm.slane %v1181_v14, 3 }
 0x157   : > { %v1107_v38 = vadd.f32 %v1106_v31, %v1093_v34 }
 0x159   : > { %v1112_v42 = vmax.f32 %v1107_v38, 0.0  ;;  %v1185_v38 = vperm.slane %v1181_v14, 2 }
 0x15a   : > { %1896 = vmatpush.bf16.msrb.mxu0 %v2994_v46  ;;  %1924 = vmatpush.bf16.msrb.mxu2 %v3010_v56 }
 0x15c   : > { %v1094_v37 = vpop.f32.mrf.mxu2 }
 0x15d   : > { %v1095_v39 = vadd.f32 %v1094_v37, %v1081_v36  ;;  %v1108_v40 = vpop.f32.mrf.mxu3 }
 0x15e   : > { %1897 = vmatpush.bf16.msrb.mxu0 %v2993_v48  ;;  %1925 = vmatpush.bf16.msrb.mxu2 %v3009_v60 }
 0x15f   : > { %v1109_v41 = vadd.f32 %v1108_v40, %v1095_v39 }
 0x161   : > { %v1114_v43 = vmax.f32 %v1109_v41, 0.0 }
 0x162   : > { %1898 = vmatpush.bf16.msrb.mxu0 %v2992_v50  ;;  %1926 = vmatpush.bf16.msrb.mxu2 %v3008_v0 }
 0x163   : > { %v1116_v44 = vpack.c.bf16 %v1114_v43, %v1112_v42 }
 0x165   : > { %1533 = vmatmul.bf16.vlgmr.msrb.gmra.mxu1 %v1116_v44  ;;  %1561 = vmatmul.bf16.vlgmr.msrb.gmra.mxu3 %v1116_v44 }
 0x166   : > { %1575 = vmatmul.bf16.vlgmr.msra.gmra.mxu0 %v1115_v29  ;;  %1603 = vmatmul.bf16.vlgmr.msra.gmra.mxu2 %v1115_v29 }
 0x167   : > { %1909 = vmatpush.bf16.msrb.mxu1 %v3003_v47  ;;  %1899 = vmatpush.bf16.msrb.mxu0 %v2991_v52 }
 0x168   : > { %1937 = vmatpush.bf16.msrb.mxu3 %v3019_v58  ;;  %1927 = vmatpush.bf16.msrb.mxu2 %v3007_v3 }
 0x16b   : > { %1910 = vmatpush.bf16.msrb.mxu1 %v3002_v49  ;;  %1900 = vmatpush.bf16.msrb.mxu0 %v2990_v55 }
 0x16c   : > { %1938 = vmatpush.bf16.msrb.mxu3 %v3018_v62  ;;  %1928 = vmatpush.bf16.msrb.mxu2 %v3006_v6 }
 0x16f   : > { %1911 = vmatpush.bf16.msrb.mxu1 %v3001_v51  ;;  %1901 = vmatpush.bf16.msrb.mxu0 %v2989_v59 }
 0x170   : > { %1939 = vmatpush.bf16.msrb.mxu3 %v3017_v2  ;;  %1929 = vmatpush.bf16.msrb.mxu2 %v3005_v9 }
 0x173   : > { %1912 = vmatpush.bf16.msrb.mxu1 %v3000_v54  ;;  %1902 = vmatpush.bf16.msrb.mxu0 %v2988_v63  ;;  %v3028_v63 = vld [vmem:[%s4201_s8] ss:$0 sm:$0xff] }
 0x174   : > { %1940 = vmatpush.bf16.msrb.mxu3 %v3016_v5  ;;  %1930 = vmatpush.bf16.msrb.mxu2 %v3004_v11 }
 0x175   : > { %1589 = vmatmul.bf16.vlgmr.msra.gmra.mxu1 %v1116_v44  ;;  %1617 = vmatmul.bf16.vlgmr.msra.gmra.mxu3 %v1116_v44 }
 0x177   : > { %1913 = vmatpush.bf16.msrb.mxu1 %v2999_v57 }
 0x178   : > { %1941 = vmatpush.bf16.msrb.mxu3 %v3015_v7 }
 0x17b   : > { %1914 = vmatpush.bf16.msrb.mxu1 %v2998_v61 }
 0x17c   : > { %1942 = vmatpush.bf16.msrb.mxu3 %v3014_v10 }
 0x17f   : > { %1915 = vmatpush.bf16.msrb.mxu1 %v2997_v1 }
 0x180   : > { %1943 = vmatpush.bf16.msrb.mxu3 %v3013_v13 }
 0x183   : > { %1916 = vmatpush.bf16.msrb.mxu1 %v2996_v4 }
 0x184   : > { %1944 = vmatpush.bf16.msrb.mxu3 %v3012_v18 }
 0x1d2   : > { %v1520_v8 = vpop.f32.mrf.mxu0 }
 0x1d3   : > { %v1521_v19 = vadd.f32 %v1520_v8, %v1183_v17 }
 0x1d8   : > { %v1548_v12 = vpop.f32.mrf.mxu2 }
 0x1d9   : > { %v1549_v29 = vadd.f32 %v1548_v12, %v1184_v23 }
 0x1da   : > { %v1522_v15 = vpop.f32.mrf.mxu0 }
 0x1db   : > { %v1523_v24 = vadd.f32 %v1522_v15, %v1183_v17 }
 0x1e0   : > { %v1550_v21 = vpop.f32.mrf.mxu2 }
 0x1e1   : > { %v1551_v31 = vadd.f32 %v1550_v21, %v1184_v23 }
 0x1e2   : > { %v1534_v16 = vpop.f32.mrf.mxu1 }
 0x1e3   : > { %v1535_v25 = vadd.f32 %v1534_v16, %v1521_v19  ;;  %v1576_v28 = vpop.f32.mrf.mxu0 }
 0x1e4   : > { %v1577_v43 = vadd.f32 %v1576_v28, %v1185_v38 }
 0x1e5   : > { %v1623_v30 = vmax.f32 %v1535_v25, 0.0 }
 0x1e8   : > { %v1562_v22 = vpop.f32.mrf.mxu3 }
 0x1e9   : > { %v1563_v32 = vadd.f32 %v1562_v22, %v1549_v29  ;;  %v1604_v36 = vpop.f32.mrf.mxu2 }
 0x1ea   : > { %v1536_v26 = vpop.f32.mrf.mxu1  ;;  %v1605_v51 = vadd.f32 %v1604_v36, %v1186_v45 }
 0x1eb   : > { %v1537_v27 = vadd.f32 %v1536_v26, %v1523_v24  ;;  %v1624_v39 = vmax.f32 %v1563_v32, 0.0  ;;  %v1578_v42 = vpop.f32.mrf.mxu0 }
 0x1ec   : > { %v1579_v46 = vadd.f32 %v1578_v42, %v1185_v38 }
 0x1ed   : > { %v1627_v20 = vmax.f32 %v1537_v27, 0.0 }
 0x1ef   : > { %v1631_v33 = vpack.c.bf16 %v1627_v20, %v1623_v30 }
 0x1f0   : > { %v1564_v34 = vpop.f32.mrf.mxu3 }
 0x1f1   : > { %v1565_v35 = vadd.f32 %v1564_v34, %v1551_v31  ;;  %1903 = vmatmul.bf16.vlgmr.msrb.gmra.mxu0 %v1631_v33  ;;  %v1606_v50 = vpop.f32.mrf.mxu2 }
 0x1f2   : > { %v1590_v37 = vpop.f32.mrf.mxu1  ;;  %v1607_v54 = vadd.f32 %v1606_v50, %v1186_v45 }
 0x1f3   : > { %v1628_v40 = vmax.f32 %v1565_v35, 0.0  ;;  %v1591_v47 = vadd.f32 %v1590_v37, %v1577_v43 }
 0x1f5   : > { %v1632_v41 = vpack.c.bf16 %v1628_v40, %v1624_v39  ;;  %v1625_v52 = vmax.f32 %v1591_v47, 0.0 }
 0x1f7   : > { %1917 = vmatmul.bf16.vlgmr.msrb.gmra.mxu1 %v1632_v41 }
 0x1f8   : > { %v1618_v44 = vpop.f32.mrf.mxu3 }
 0x1f9   : > { %v1619_v55 = vadd.f32 %v1618_v44, %v1605_v51 }
 0x1fa   : > { %v1592_v48 = vpop.f32.mrf.mxu1 }
 0x1fb   : > { %v1593_v49 = vadd.f32 %v1592_v48, %v1579_v46  ;;  %v1626_v59 = vmax.f32 %v1619_v55, 0.0 }
 0x1fd   : > { %v1629_v53 = vmax.f32 %v1593_v49, 0.0 }
 0x1ff   : > { %v1633_v56 = vpack.c.bf16 %v1629_v53, %v1625_v52 }
 0x200   : > { %v1620_v57 = vpop.f32.mrf.mxu3 }
 0x201   : > { %v1621_v58 = vadd.f32 %v1620_v57, %v1607_v54  ;;  %1931 = vmatmul.bf16.vlgmr.msrb.gmra.mxu2 %v1633_v56 }
 0x203   : > { %v1630_v60 = vmax.f32 %v1621_v58, 0.0 }
 0x205   : > { %v1634_v61 = vpack.c.bf16 %v1630_v60, %v1626_v59 }
 0x207   : > { %1945 = vmatmul.bf16.vlgmr.msrb.gmra.mxu3 %v1634_v61 }
 0x26e   : > { %v1904_v62 = vpop.f32.mrf.mxu0 }
 0x26f   : > { %v1905_v2 = vadd.f32 %v3028_v63, %v1904_v62 }
 0x274   : > { %v1918_v0 = vpop.f32.mrf.mxu1 }
 0x275   : > { %v1919_v3 = vadd.f32 %v1918_v0, %v1905_v2 }
 0x276   : > { %v1906_v5 = vpop.f32.mrf.mxu0 }
 0x277   : > { %v1907_v9 = vadd.f32 %v3028_v63, %v1906_v5 }
 0x27c   : > { %v1920_v8 = vpop.f32.mrf.mxu1 }
 0x27d   : > { %v1921_v12 = vadd.f32 %v1920_v8, %v1907_v9 }
 0x284   : > { %v1932_v1 = vpop.f32.mrf.mxu2 }
 0x285   : > { %v1933_v4 = vadd.f32 %v1932_v1, %v1919_v3 }
 0x28a   : > { %v1946_v6 = vpop.f32.mrf.mxu3 }
 0x28b   : > { %v1947_v7 = vadd.f32 %v1946_v6, %v1933_v4 }
 0x28c   : > { %v1934_v11 = vpop.f32.mrf.mxu2 }
 0x28d   : > { %v2824_v10 = vmul.f32 -1.442695, %v1947_v7  ;;  %v1935_v13 = vadd.f32 %v1934_v11, %v1921_v12 }
 0x28f   : > { %3029 = vpow2.f32 %v2824_v10 }
 0x292   : > { %v1948_v14 = vpop.f32.mrf.mxu3 }
 0x293   : > { %v1949_v15 = vadd.f32 %v1948_v14, %v1935_v13 }
 0x295   : > { %v3030_v16 = vpop.eup %3029  ;;  %v2825_v17 = vmul.f32 -1.442695, %v1949_v15 }
 0x296   : > { %v1957_v18 = vadd.f32 1.0, %v3030_v16 }
 0x297   : > { %3031 = vpow2.f32 %v2825_v17 }
 0x298   : > { %3033 = vrcp.f32 %v1957_v18  ;;  %v1970_v25 = vand.u32 2147483648, %v1957_v18  ;;  %v1968_v27 = vand.u32 2147483647, %v1957_v18  ;;  %vm1964_vm1 = vweird.f32 %v1957_v18 }
 0x29a   : > { %v1971_v30 = vor.u32 1.1754944e-38, %v1970_v25  ;;  %vm1969_vm3 = vcmp.eq.f32.partialorder %v1968_v27, 8.507059e+37 }
 0x29d   : > { %v3032_v19 = vpop.eup %3031 }
 0x29e   : > { %v3034_v21 = vpop.eup %3033  ;;  %v1958_v22 = vadd.f32 1.0, %v3032_v19 }
 0x29f   : > { %v1960_v23 = vmul.f32 %v3034_v21, %v1957_v18  ;;  %vm1965_vm0 = vweird.f32 %v3034_v21 }
 0x2a0   : > { %3035 = vrcp.f32 %v1958_v22  ;;  %vm1966_vm2 = vmor %vm1964_vm1, %vm1965_vm0  ;;  %v1985_v34 = vand.u32 2147483648, %v1958_v22  ;;  %v1983_v36 = vand.u32 2147483647, %v1958_v22  ;;  %vm1979_vm5 = vweird.f32 %v1958_v22 }
 0x2a1   : > { %v1961_v24 = vsub.f32 1.0, %v1960_v23 }
 0x2a2   : > { %v1986_v38 = vor.u32 1.1754944e-38, %v1985_v34  ;;  %vm1984_vm7 = vcmp.eq.f32.partialorder %v1983_v36, 8.507059e+37 }
 0x2a3   : > { %v1962_v26 = vmul.f32 %v3034_v21, %v1961_v24 }
 0x2a5   : > { %v1963_v28 = vadd.f32 %v3034_v21, %v1962_v26 }
 0x2a6   : > { %v3036_v29 = vpop.eup %3035 }
 0x2a7   : > { %v1967_v20 = vsel %vm1966_vm2, %v3034_v21, %v1963_v28  ;;  %v1975_v31 = vmul.f32 %v3036_v29, %v1958_v22  ;;  %vm1980_vm4 = vweird.f32 %v3036_v29 }
 0x2a8   : > { %v1972_v32 = vsel %vm1969_vm3, %v1971_v30, %v1967_v20  ;;  %vm1981_vm6 = vmor %vm1979_vm5, %vm1980_vm4 }
 0x2a9   : > { %1989 = vst [vmem:[%s334_s20] sm:$0xff] %v1972_v32  ;;  %v1976_v33 = vsub.f32 1.0, %v1975_v31 }
 0x2ab   : > { %v1977_v35 = vmul.f32 %v3036_v29, %v1976_v33 }
 0x2ad   : > { %v1978_v37 = vadd.f32 %v3036_v29, %v1977_v35 }
 0x2af   : > { %v1982_v39 = vsel %vm1981_vm6, %v3036_v29, %v1978_v37 }
 0x2b0   : > { %v1987_v40 = vsel %vm1984_vm7, %v1986_v38, %v1982_v39 }
 0x2b1   : > { %1990 = vst [vmem:[%s334_s20 + $0x8] sm:$0xff] %v1987_v40 }
 0x2b2 PF: > { %s19_s30 = sadd.s32 1, %s3043_s30  }
 0x2b3   : > { %p16_p4 = scmp.ge.s32.totalorder %s19_s30, 4  }
 0x2b5   :  { %18 = sbr.rel (!%p16_p4) target bundleno = 1 (0x1), region = 86 }

</bundles_post_ra>
